<compile_context>
chip_gen: v6e
topology: v6e:2x2x1
jax: 0.10.0
libtpu: 0.0.40
codegen_flags: <defaults>
</compile_context>

<pallas_src>
import numpy as np
import jax
import jax.numpy as jnp
from jax import lax
from jax.experimental import pallas as pl
from jax.experimental.pallas import tpu as pltpu

HIDDEN_SIZE = 128
C1, K1 = 6, 10      # conv1: Conv2d(1, 6, 10)
C3, K3 = 12, 5      # conv3: Conv2d(6, 12, 5)


def _img_compression_kernel(img_ref, b1_row_ref, b3_row_ref, bfc_ref,
                            band1_ref, rsel1_ref, csel1_ref,
                            band3_ref, rsel2_ref, csel2_ref,
                            wfc_ref, o_ref, acc1_ref, acc3_ref):
    f32 = jnp.float32
    k1 = band1_ref.shape[0]
    k3 = band3_ref.shape[0]
    oh1 = acc1_ref.shape[0]
    oh3 = acc3_ref.shape[0]
    ph2 = wfc_ref.shape[0]

    # ---- conv1: sum over the K1 row offsets of a banded MXU matmul ---------
    acc1_ref[...] = jnp.dot(img_ref[0:oh1, :], band1_ref[0],
                            preferred_element_type=f32)
    for di in range(1, k1):
        acc1_ref[...] += jnp.dot(img_ref[di:di + oh1, :], band1_ref[di],
                                 preferred_element_type=f32)

    # ---- 2x2 stride-2 max pool: window max + exact 0/1 selection matmuls ---
    def maxpool(acc_ref, rsel, csel):
        nr, nc = acc_ref.shape
        win = jnp.maximum(
            jnp.maximum(acc_ref[0:nr - 1, 0:nc - 1], acc_ref[0:nr - 1, 1:nc]),
            jnp.maximum(acc_ref[1:nr, 0:nc - 1], acc_ref[1:nr, 1:nc]))
        pooled_rows = jnp.dot(rsel, win, preferred_element_type=f32)
        return jnp.dot(pooled_rows, csel, preferred_element_type=f32)

    # conv1 bias is constant per channel block -> commutes with max pooling
    p1 = maxpool(acc1_ref, rsel1_ref[...], csel1_ref[...]) + b1_row_ref[...]

    # ---- conv3 (6 -> 12 ch); input channels folded into the matmul K dim ---
    acc3_ref[...] = jnp.dot(p1[0:oh3, :], band3_ref[0],
                            preferred_element_type=f32)
    for di in range(1, k3):
        acc3_ref[...] += jnp.dot(p1[di:di + oh3, :], band3_ref[di],
                                 preferred_element_type=f32)

    p2 = maxpool(acc3_ref, rsel2_ref[...], csel2_ref[...]) + b3_row_ref[...]

    # ---- flatten (channel-major) + Linear + dropout + ReLU ------------------
    # TODO(synk): nn.Dropout(p=0.2) is implemented as the inference-mode
    # identity (no train-mode random masking).
    y = bfc_ref[...]
    for h in range(ph2):
        y = y + jnp.dot(p2[h:h + 1, :], wfc_ref[h], preferred_element_type=f32)
    o_ref[...] = jnp.maximum(y, 0.0)          # (1, 128) lane-dense store


# ------------------------- wrapper-side constants ---------------------------
def _band_indicator(k, in_len, out_len):
    d = np.arange(in_len)[:, None] - np.arange(out_len)[None, :]
    return jnp.asarray(np.stack([(d == j) for j in range(k)]).astype(np.float32))


def _row_select(n_pool, n_in):
    a = np.arange(n_pool)[:, None]
    i = np.arange(n_in)[None, :]
    return jnp.asarray((i == 2 * a).astype(np.float32))           # (n_pool, n_in)


def _col_select(n_in, n_chan, chan_stride, n_pool):
    j = np.arange(n_in)[:, None]
    cb = np.arange(n_chan * n_pool)[None, :]
    c, b = cb // n_pool, cb % n_pool
    return jnp.asarray((j == c * chan_stride + 2 * b).astype(np.float32))


@jax.jit
def img_compression_forward(img, params):
    """Pallas forward of img_compression_net (eval mode). img: (1,1,H,W) f32."""
    img2d = img.reshape(img.shape[-2], img.shape[-1]).astype(jnp.float32)
    H, W = img2d.shape
    w1, b1 = params["conv1_w"], params["conv1_b"]      # (C1,1,K1,K1), (C1,)
    w3, b3 = params["conv3_w"], params["conv3_b"]      # (C3,C1,K3,K3), (C3,)
    wfc, bfc = params["fc_w"], params["fc_b"]          # (128, T), (128,)
    out_size = wfc.shape[0]

    oh1, ow1 = H - K1 + 1, W - K1 + 1
    ph1, pw1 = oh1 // 2, ow1 // 2
    oh3, ow3 = ph1 - K3 + 1, pw1 - K3 + 1
    ph2, pw2 = oh3 // 2, ow3 // 2
    assert wfc.shape[1] == C3 * ph2 * pw2, "fc_w does not match the image size"

    # ---- one-time weight layout preprocessing (banded conv weights) --------
    band1 = jnp.einsum("cdj,jmx->dmcx", w1[:, 0], _band_indicator(K1, W, ow1))
    band1 = band1.reshape(K1, W, C1 * ow1)                   # (K1, W, C1*OW1)
    band3 = jnp.einsum("ocdj,jsx->dcsox", w3, _band_indicator(K3, pw1, ow3))
    band3 = band3.reshape(K3, C1 * pw1, C3 * ow3)            # (K3, C1*PW1, C3*OW3)
    wfc_arr = jnp.transpose(wfc.T.reshape(C3, ph2, pw2, out_size),
                            (1, 0, 2, 3)).reshape(ph2, C3 * pw2, out_size)
    b1_row = jnp.repeat(b1, pw1)[None, :]                    # (1, C1*PW1)
    b3_row = jnp.repeat(b3, pw2)[None, :]                    # (1, C3*PW2)
    bfc_row = bfc[None, :]                                   # (1, out_size)

    rsel1 = _row_select(ph1, oh1 - 1)
    csel1 = _col_select(C1 * ow1 - 1, C1, ow1, pw1)
    rsel2 = _row_select(ph2, oh3 - 1)
    csel2 = _col_select(C3 * ow3 - 1, C3, ow3, pw2)

    vmem = pl.BlockSpec(memory_space=pltpu.MemorySpace.VMEM)
    args = (img2d, b1_row, b3_row, bfc_row,
            band1, rsel1, csel1, band3, rsel2, csel2, wfc_arr)

    # TODO(synk): for the real transitive_size=108300 (400x400 input) the FC
    # weight is ~55 MB and must be K-tiled over a grid instead of a single
    # VMEM-resident block.
    out = pl.pallas_call(
        _img_compression_kernel,
        out_shape=jax.ShapeDtypeStruct((1, out_size), jnp.float32),
        in_specs=[vmem] * len(args),
        out_specs=vmem,
        scratch_shapes=[pltpu.VMEM((oh1, C1 * ow1), jnp.float32),
                        pltpu.VMEM((oh3, C3 * ow3), jnp.float32)],
    )(*args)
    return out[0]


# ------------------------------ reference -----------------------------------
def init_params(key, H, W):
    oh1, ow1 = H - K1 + 1, W - K1 + 1
    ph1, pw1 = oh1 // 2, ow1 // 2
    oh3, ow3 = ph1 - K3 + 1, pw1 - K3 + 1
    ph2, pw2 = oh3 // 2, ow3 // 2
    transitive = C3 * ph2 * pw2

    def u(k, shape, fan_in):
        bound = 1.0 / float(np.sqrt(fan_in))
        return jax.random.uniform(k, shape, jnp.float32, -bound, bound)

    ks = jax.random.split(key, 6)
    return {
        "conv1_w": u(ks[0], (C1, 1, K1, K1), K1 * K1),
        "conv1_b": u(ks[1], (C1,), K1 * K1),
        "conv3_w": u(ks[2], (C3, C1, K3, K3), C1 * K3 * K3),
        "conv3_b": u(ks[3], (C3,), C1 * K3 * K3),
        "fc_w":    u(ks[4], (HIDDEN_SIZE, transitive), transitive),
        "fc_b":    u(ks[5], (HIDDEN_SIZE,), transitive),
    }


def reference_forward(img, params):
    """Pure-JAX (XLA) reference of the PyTorch forward (eval mode)."""
    x = img.reshape(1, 1, img.shape[-2], img.shape[-1]).astype(jnp.float32)
    dn = ("NCHW", "OIHW", "NCHW")
    y = lax.conv_general_dilated(x, params["conv1_w"], (1, 1), "VALID",
                                 dimension_numbers=dn,
                                 precision=lax.Precision.HIGHEST)
    y = y + params["conv1_b"][None, :, None, None]
    y = lax.reduce_window(y, -jnp.inf, lax.max, (1, 1, 2, 2), (1, 1, 2, 2), "VALID")
    y = lax.conv_general_dilated(y, params["conv3_w"], (1, 1), "VALID",
                                 dimension_numbers=dn,
                                 precision=lax.Precision.HIGHEST)
    y = y + params["conv3_b"][None, :, None, None]
    y = lax.reduce_window(y, -jnp.inf, lax.max, (1, 1, 2, 2), (1, 1, 2, 2), "VALID")
    flat = y.reshape(-1)                                   # torch.flatten
    z = jnp.matmul(params["fc_w"], flat, precision=lax.Precision.HIGHEST)
    z = z + params["fc_b"]
    return jnp.maximum(z, 0.0)                             # dropout = identity


if __name__ == "__main__":
    key = jax.random.PRNGKey(0)
    k_img, k_par = jax.random.split(key)

    H = W = 38          # small image -> transitive_size = 12*5*5 = 300
    img = jax.random.normal(k_img, (1, 1, H, W), dtype=jnp.float32)
    params = init_params(k_par, H, W)

    out = img_compression_forward(img, params)
    out = jax.block_until_ready(out)

    ref = reference_forward(img, params)
    assert out.shape == (HIDDEN_SIZE,)
    max_diff = float(jnp.max(jnp.abs(out - ref)))
    # tolerance covers MXU fp32-emulation rounding vs the HIGHEST-precision
    # XLA reference path; any structural bug would be orders of magnitude larger
    assert jnp.allclose(out, ref, atol=5e-3, rtol=5e-3), (
        f"mismatch vs reference (max|diff|={max_diff})")
    print("KERNEL_OK")
</pallas_src>

<mosaic_0001>
module attributes {stable_mosaic.version = 11 : i64} {
  func.func @_img_compression_kernel(%arg0: memref<38x38xf32, #tpu.memory_space<vmem>>, %arg1: memref<1x84xf32, #tpu.memory_space<vmem>>, %arg2: memref<1x60xf32, #tpu.memory_space<vmem>>, %arg3: memref<1x128xf32, #tpu.memory_space<vmem>>, %arg4: memref<10x38x174xf32, #tpu.memory_space<vmem>>, %arg5: memref<14x28xf32, #tpu.memory_space<vmem>>, %arg6: memref<173x84xf32, #tpu.memory_space<vmem>>, %arg7: memref<5x84x120xf32, #tpu.memory_space<vmem>>, %arg8: memref<5x9xf32, #tpu.memory_space<vmem>>, %arg9: memref<119x60xf32, #tpu.memory_space<vmem>>, %arg10: memref<5x60x128xf32, #tpu.memory_space<vmem>>, %arg11: memref<1x128xf32, #tpu.memory_space<vmem>>, %arg12: memref<29x174xf32, #tpu.memory_space<vmem>>, %arg13: memref<10x120xf32, #tpu.memory_space<vmem>>) attributes {dimension_semantics = [], scalar_prefetch = 0 : i64, scratch_operands = 2 : i64, tpu.core_type = #tpu.core_type<tc>} {
    %c0 = arith.constant 0 : index
    %c0_0 = arith.constant 0 : index
    %0 = vector.load %arg0[%c0, %c0_0] : memref<38x38xf32, #tpu.memory_space<vmem>>, vector<29x38xf32>
    %c0_1 = arith.constant 0 : index
    %c0_2 = arith.constant 0 : index
    %c0_3 = arith.constant 0 : index
    %1 = vector.load %arg4[%c0_1, %c0_2, %c0_3] : memref<10x38x174xf32, #tpu.memory_space<vmem>>, vector<1x38x174xf32>
    %2 = vector.shape_cast %1 : vector<1x38x174xf32> to vector<38x174xf32>
    %cst = arith.constant dense<0.000000e+00> : vector<29x174xf32>
    %3 = tpu.matmul %0, %2, %cst {dimension_numbers = #tpu.dot_dimension_numbers<[1], [0], [0], [1], [0, 0, 1, 1], [], []>} : vector<29x38xf32>, vector<38x174xf32>, vector<29x174xf32> -> vector<29x174xf32>
    %c0_4 = arith.constant 0 : index
    %c0_5 = arith.constant 0 : index
    %4 = vector.load %arg12[%c0_4, %c0_5] : memref<29x174xf32, #tpu.memory_space<vmem>>, vector<29x174xf32>
    tpu.vector_store %arg12[%c0_4, %c0_5], %3 {strides = array<i32>} : memref<29x174xf32, #tpu.memory_space<vmem>>, vector<29x174xf32>,
    %c0_6 = arith.constant 0 : index
    %c0_7 = arith.constant 0 : index
    %5 = vector.load %arg12[%c0_6, %c0_7] : memref<29x174xf32, #tpu.memory_space<vmem>>, vector<29x174xf32>
    %c1 = arith.constant 1 : index
    %c0_8 = arith.constant 0 : index
    %6 = vector.load %arg0[%c1, %c0_8] : memref<38x38xf32, #tpu.memory_space<vmem>>, vector<29x38xf32>
    %c1_9 = arith.constant 1 : index
    %c0_10 = arith.constant 0 : index
    %c0_11 = arith.constant 0 : index
    %7 = vector.load %arg4[%c1_9, %c0_10, %c0_11] : memref<10x38x174xf32, #tpu.memory_space<vmem>>, vector<1x38x174xf32>
    %8 = vector.shape_cast %7 : vector<1x38x174xf32> to vector<38x174xf32>
    %cst_12 = arith.constant dense<0.000000e+00> : vector<29x174xf32>
    %9 = tpu.matmul %6, %8, %cst_12 {dimension_numbers = #tpu.dot_dimension_numbers<[1], [0], [0], [1], [0, 0, 1, 1], [], []>} : vector<29x38xf32>, vector<38x174xf32>, vector<29x174xf32> -> vector<29x174xf32>
    %10 = arith.addf %5, %9 : vector<29x174xf32>
    %c0_13 = arith.constant 0 : index
    %c0_14 = arith.constant 0 : index
    %11 = vector.load %arg12[%c0_13, %c0_14] : memref<29x174xf32, #tpu.memory_space<vmem>>, vector<29x174xf32>
    tpu.vector_store %arg12[%c0_13, %c0_14], %10 {strides = array<i32>} : memref<29x174xf32, #tpu.memory_space<vmem>>, vector<29x174xf32>,
    %c0_15 = arith.constant 0 : index
    %c0_16 = arith.constant 0 : index
    %12 = vector.load %arg12[%c0_15, %c0_16] : memref<29x174xf32, #tpu.memory_space<vmem>>, vector<29x174xf32>
    %c2 = arith.constant 2 : index
    %c0_17 = arith.constant 0 : index
    %13 = vector.load %arg0[%c2, %c0_17] : memref<38x38xf32, #tpu.memory_space<vmem>>, vector<29x38xf32>
    %c2_18 = arith.constant 2 : index
    %c0_19 = arith.constant 0 : index
    %c0_20 = arith.constant 0 : index
    %14 = vector.load %arg4[%c2_18, %c0_19, %c0_20] : memref<10x38x174xf32, #tpu.memory_space<vmem>>, vector<1x38x174xf32>
    %15 = vector.shape_cast %14 : vector<1x38x174xf32> to vector<38x174xf32>
    %cst_21 = arith.constant dense<0.000000e+00> : vector<29x174xf32>
    %16 = tpu.matmul %13, %15, %cst_21 {dimension_numbers = #tpu.dot_dimension_numbers<[1], [0], [0], [1], [0, 0, 1, 1], [], []>} : vector<29x38xf32>, vector<38x174xf32>, vector<29x174xf32> -> vector<29x174xf32>
    %17 = arith.addf %12, %16 : vector<29x174xf32>
    %c0_22 = arith.constant 0 : index
    %c0_23 = arith.constant 0 : index
    %18 = vector.load %arg12[%c0_22, %c0_23] : memref<29x174xf32, #tpu.memory_space<vmem>>, vector<29x174xf32>
    tpu.vector_store %arg12[%c0_22, %c0_23], %17 {strides = array<i32>} : memref<29x174xf32, #tpu.memory_space<vmem>>, vector<29x174xf32>,
    %c0_24 = arith.constant 0 : index
    %c0_25 = arith.constant 0 : index
    %19 = vector.load %arg12[%c0_24, %c0_25] : memref<29x174xf32, #tpu.memory_space<vmem>>, vector<29x174xf32>
    %c3 = arith.constant 3 : index
    %c0_26 = arith.constant 0 : index
    %20 = vector.load %arg0[%c3, %c0_26] : memref<38x38xf32, #tpu.memory_space<vmem>>, vector<29x38xf32>
    %c3_27 = arith.constant 3 : index
    %c0_28 = arith.constant 0 : index
    %c0_29 = arith.constant 0 : index
    %21 = vector.load %arg4[%c3_27, %c0_28, %c0_29] : memref<10x38x174xf32, #tpu.memory_space<vmem>>, vector<1x38x174xf32>
    %22 = vector.shape_cast %21 : vector<1x38x174xf32> to vector<38x174xf32>
    %cst_30 = arith.constant dense<0.000000e+00> : vector<29x174xf32>
    %23 = tpu.matmul %20, %22, %cst_30 {dimension_numbers = #tpu.dot_dimension_numbers<[1], [0], [0], [1], [0, 0, 1, 1], [], []>} : vector<29x38xf32>, vector<38x174xf32>, vector<29x174xf32> -> vector<29x174xf32>
    %24 = arith.addf %19, %23 : vector<29x174xf32>
    %c0_31 = arith.constant 0 : index
    %c0_32 = arith.constant 0 : index
    %25 = vector.load %arg12[%c0_31, %c0_32] : memref<29x174xf32, #tpu.memory_space<vmem>>, vector<29x174xf32>
    tpu.vector_store %arg12[%c0_31, %c0_32], %24 {strides = array<i32>} : memref<29x174xf32, #tpu.memory_space<vmem>>, vector<29x174xf32>,
    %c0_33 = arith.constant 0 : index
    %c0_34 = arith.constant 0 : index
    %26 = vector.load %arg12[%c0_33, %c0_34] : memref<29x174xf32, #tpu.memory_space<vmem>>, vector<29x174xf32>
    %c4 = arith.constant 4 : index
    %c0_35 = arith.constant 0 : index
    %27 = vector.load %arg0[%c4, %c0_35] : memref<38x38xf32, #tpu.memory_space<vmem>>, vector<29x38xf32>
    %c4_36 = arith.constant 4 : index
    %c0_37 = arith.constant 0 : index
    %c0_38 = arith.constant 0 : index
    %28 = vector.load %arg4[%c4_36, %c0_37, %c0_38] : memref<10x38x174xf32, #tpu.memory_space<vmem>>, vector<1x38x174xf32>
    %29 = vector.shape_cast %28 : vector<1x38x174xf32> to vector<38x174xf32>
    %cst_39 = arith.constant dense<0.000000e+00> : vector<29x174xf32>
    %30 = tpu.matmul %27, %29, %cst_39 {dimension_numbers = #tpu.dot_dimension_numbers<[1], [0], [0], [1], [0, 0, 1, 1], [], []>} : vector<29x38xf32>, vector<38x174xf32>, vector<29x174xf32> -> vector<29x174xf32>
    %31 = arith.addf %26, %30 : vector<29x174xf32>
    %c0_40 = arith.constant 0 : index
    %c0_41 = arith.constant 0 : index
    %32 = vector.load %arg12[%c0_40, %c0_41] : memref<29x174xf32, #tpu.memory_space<vmem>>, vector<29x174xf32>
    tpu.vector_store %arg12[%c0_40, %c0_41], %31 {strides = array<i32>} : memref<29x174xf32, #tpu.memory_space<vmem>>, vector<29x174xf32>,
    %c0_42 = arith.constant 0 : index
    %c0_43 = arith.constant 0 : index
    %33 = vector.load %arg12[%c0_42, %c0_43] : memref<29x174xf32, #tpu.memory_space<vmem>>, vector<29x174xf32>
    %c5 = arith.constant 5 : index
    %c0_44 = arith.constant 0 : index
    %34 = vector.load %arg0[%c5, %c0_44] : memref<38x38xf32, #tpu.memory_space<vmem>>, vector<29x38xf32>
    %c5_45 = arith.constant 5 : index
    %c0_46 = arith.constant 0 : index
    %c0_47 = arith.constant 0 : index
    %35 = vector.load %arg4[%c5_45, %c0_46, %c0_47] : memref<10x38x174xf32, #tpu.memory_space<vmem>>, vector<1x38x174xf32>
    %36 = vector.shape_cast %35 : vector<1x38x174xf32> to vector<38x174xf32>
    %cst_48 = arith.constant dense<0.000000e+00> : vector<29x174xf32>
    %37 = tpu.matmul %34, %36, %cst_48 {dimension_numbers = #tpu.dot_dimension_numbers<[1], [0], [0], [1], [0, 0, 1, 1], [], []>} : vector<29x38xf32>, vector<38x174xf32>, vector<29x174xf32> -> vector<29x174xf32>
    %38 = arith.addf %33, %37 : vector<29x174xf32>
    %c0_49 = arith.constant 0 : index
    %c0_50 = arith.constant 0 : index
    %39 = vector.load %arg12[%c0_49, %c0_50] : memref<29x174xf32, #tpu.memory_space<vmem>>, vector<29x174xf32>
    tpu.vector_store %arg12[%c0_49, %c0_50], %38 {strides = array<i32>} : memref<29x174xf32, #tpu.memory_space<vmem>>, vector<29x174xf32>,
    %c0_51 = arith.constant 0 : index
    %c0_52 = arith.constant 0 : index
    %40 = vector.load %arg12[%c0_51, %c0_52] : memref<29x174xf32, #tpu.memory_space<vmem>>, vector<29x174xf32>
    %c6 = arith.constant 6 : index
    %c0_53 = arith.constant 0 : index
    %41 = vector.load %arg0[%c6, %c0_53] : memref<38x38xf32, #tpu.memory_space<vmem>>, vector<29x38xf32>
    %c6_54 = arith.constant 6 : index
    %c0_55 = arith.constant 0 : index
    %c0_56 = arith.constant 0 : index
    %42 = vector.load %arg4[%c6_54, %c0_55, %c0_56] : memref<10x38x174xf32, #tpu.memory_space<vmem>>, vector<1x38x174xf32>
    %43 = vector.shape_cast %42 : vector<1x38x174xf32> to vector<38x174xf32>
    %cst_57 = arith.constant dense<0.000000e+00> : vector<29x174xf32>
    %44 = tpu.matmul %41, %43, %cst_57 {dimension_numbers = #tpu.dot_dimension_numbers<[1], [0], [0], [1], [0, 0, 1, 1], [], []>} : vector<29x38xf32>, vector<38x174xf32>, vector<29x174xf32> -> vector<29x174xf32>
    %45 = arith.addf %40, %44 : vector<29x174xf32>
    %c0_58 = arith.constant 0 : index
    %c0_59 = arith.constant 0 : index
    %46 = vector.load %arg12[%c0_58, %c0_59] : memref<29x174xf32, #tpu.memory_space<vmem>>, vector<29x174xf32>
    tpu.vector_store %arg12[%c0_58, %c0_59], %45 {strides = array<i32>} : memref<29x174xf32, #tpu.memory_space<vmem>>, vector<29x174xf32>,
    %c0_60 = arith.constant 0 : index
    %c0_61 = arith.constant 0 : index
    %47 = vector.load %arg12[%c0_60, %c0_61] : memref<29x174xf32, #tpu.memory_space<vmem>>, vector<29x174xf32>
    %c7 = arith.constant 7 : index
    %c0_62 = arith.constant 0 : index
    %48 = vector.load %arg0[%c7, %c0_62] : memref<38x38xf32, #tpu.memory_space<vmem>>, vector<29x38xf32>
    %c7_63 = arith.constant 7 : index
    %c0_64 = arith.constant 0 : index
    %c0_65 = arith.constant 0 : index
    %49 = vector.load %arg4[%c7_63, %c0_64, %c0_65] : memref<10x38x174xf32, #tpu.memory_space<vmem>>, vector<1x38x174xf32>
    %50 = vector.shape_cast %49 : vector<1x38x174xf32> to vector<38x174xf32>
    %cst_66 = arith.constant dense<0.000000e+00> : vector<29x174xf32>
    %51 = tpu.matmul %48, %50, %cst_66 {dimension_numbers = #tpu.dot_dimension_numbers<[1], [0], [0], [1], [0, 0, 1, 1], [], []>} : vector<29x38xf32>, vector<38x174xf32>, vector<29x174xf32> -> vector<29x174xf32>
    %52 = arith.addf %47, %51 : vector<29x174xf32>
    %c0_67 = arith.constant 0 : index
    %c0_68 = arith.constant 0 : index
    %53 = vector.load %arg12[%c0_67, %c0_68] : memref<29x174xf32, #tpu.memory_space<vmem>>, vector<29x174xf32>
    tpu.vector_store %arg12[%c0_67, %c0_68], %52 {strides = array<i32>} : memref<29x174xf32, #tpu.memory_space<vmem>>, vector<29x174xf32>,
    %c0_69 = arith.constant 0 : index
    %c0_70 = arith.constant 0 : index
    %54 = vector.load %arg12[%c0_69, %c0_70] : memref<29x174xf32, #tpu.memory_space<vmem>>, vector<29x174xf32>
    %c8 = arith.constant 8 : index
    %c0_71 = arith.constant 0 : index
    %55 = vector.load %arg0[%c8, %c0_71] : memref<38x38xf32, #tpu.memory_space<vmem>>, vector<29x38xf32>
    %c8_72 = arith.constant 8 : index
    %c0_73 = arith.constant 0 : index
    %c0_74 = arith.constant 0 : index
    %56 = vector.load %arg4[%c8_72, %c0_73, %c0_74] : memref<10x38x174xf32, #tpu.memory_space<vmem>>, vector<1x38x174xf32>
    %57 = vector.shape_cast %56 : vector<1x38x174xf32> to vector<38x174xf32>
    %cst_75 = arith.constant dense<0.000000e+00> : vector<29x174xf32>
    %58 = tpu.matmul %55, %57, %cst_75 {dimension_numbers = #tpu.dot_dimension_numbers<[1], [0], [0], [1], [0, 0, 1, 1], [], []>} : vector<29x38xf32>, vector<38x174xf32>, vector<29x174xf32> -> vector<29x174xf32>
    %59 = arith.addf %54, %58 : vector<29x174xf32>
    %c0_76 = arith.constant 0 : index
    %c0_77 = arith.constant 0 : index
    %60 = vector.load %arg12[%c0_76, %c0_77] : memref<29x174xf32, #tpu.memory_space<vmem>>, vector<29x174xf32>
    tpu.vector_store %arg12[%c0_76, %c0_77], %59 {strides = array<i32>} : memref<29x174xf32, #tpu.memory_space<vmem>>, vector<29x174xf32>,
    %c0_78 = arith.constant 0 : index
    %c0_79 = arith.constant 0 : index
    %61 = vector.load %arg12[%c0_78, %c0_79] : memref<29x174xf32, #tpu.memory_space<vmem>>, vector<29x174xf32>
    %c9 = arith.constant 9 : index
    %c0_80 = arith.constant 0 : index
    %62 = vector.load %arg0[%c9, %c0_80] : memref<38x38xf32, #tpu.memory_space<vmem>>, vector<29x38xf32>
    %c9_81 = arith.constant 9 : index
    %c0_82 = arith.constant 0 : index
    %c0_83 = arith.constant 0 : index
    %63 = vector.load %arg4[%c9_81, %c0_82, %c0_83] : memref<10x38x174xf32, #tpu.memory_space<vmem>>, vector<1x38x174xf32>
    %64 = vector.shape_cast %63 : vector<1x38x174xf32> to vector<38x174xf32>
    %cst_84 = arith.constant dense<0.000000e+00> : vector<29x174xf32>
    %65 = tpu.matmul %62, %64, %cst_84 {dimension_numbers = #tpu.dot_dimension_numbers<[1], [0], [0], [1], [0, 0, 1, 1], [], []>} : vector<29x38xf32>, vector<38x174xf32>, vector<29x174xf32> -> vector<29x174xf32>
    %66 = arith.addf %61, %65 : vector<29x174xf32>
    %c0_85 = arith.constant 0 : index
    %c0_86 = arith.constant 0 : index
    %67 = vector.load %arg12[%c0_85, %c0_86] : memref<29x174xf32, #tpu.memory_space<vmem>>, vector<29x174xf32>
    tpu.vector_store %arg12[%c0_85, %c0_86], %66 {strides = array<i32>} : memref<29x174xf32, #tpu.memory_space<vmem>>, vector<29x174xf32>,
    %c0_87 = arith.constant 0 : index
    %c0_88 = arith.constant 0 : index
    %68 = vector.load %arg5[%c0_87, %c0_88] : memref<14x28xf32, #tpu.memory_space<vmem>>, vector<14x28xf32>
    %c0_89 = arith.constant 0 : index
    %c0_90 = arith.constant 0 : index
    %69 = vector.load %arg6[%c0_89, %c0_90] : memref<173x84xf32, #tpu.memory_space<vmem>>, vector<173x84xf32>
    %c0_91 = arith.constant 0 : index
    %c0_92 = arith.constant 0 : index
    %70 = vector.load %arg12[%c0_91, %c0_92] : memref<29x174xf32, #tpu.memory_space<vmem>>, vector<28x173xf32>
    %c0_93 = arith.constant 0 : index
    %c1_94 = arith.constant 1 : index
    %71 = vector.load %arg12[%c0_93, %c1_94] : memref<29x174xf32, #tpu.memory_space<vmem>>, vector<28x173xf32>
    %72 = arith.maximumf %70, %71 : vector<28x173xf32>
    %c1_95 = arith.constant 1 : index
    %c0_96 = arith.constant 0 : index
    %73 = vector.load %arg12[%c1_95, %c0_96] : memref<29x174xf32, #tpu.memory_space<vmem>>, vector<28x173xf32>
    %c1_97 = arith.constant 1 : index
    %c1_98 = arith.constant 1 : index
    %74 = vector.load %arg12[%c1_97, %c1_98] : memref<29x174xf32, #tpu.memory_space<vmem>>, vector<28x173xf32>
    %75 = arith.maximumf %73, %74 : vector<28x173xf32>
    %76 = arith.maximumf %72, %75 : vector<28x173xf32>
    %cst_99 = arith.constant dense<0.000000e+00> : vector<14x173xf32>
    %77 = tpu.matmul %68, %76, %cst_99 {dimension_numbers = #tpu.dot_dimension_numbers<[1], [0], [0], [1], [0, 0, 1, 1], [], []>} : vector<14x28xf32>, vector<28x173xf32>, vector<14x173xf32> -> vector<14x173xf32>
    %cst_100 = arith.constant dense<0.000000e+00> : vector<14x84xf32>
    %78 = tpu.matmul %77, %69, %cst_100 {dimension_numbers = #tpu.dot_dimension_numbers<[1], [0], [0], [1], [0, 0, 1, 1], [], []>} : vector<14x173xf32>, vector<173x84xf32>, vector<14x84xf32> -> vector<14x84xf32>
    %c0_101 = arith.constant 0 : index
    %c0_102 = arith.constant 0 : index
    %79 = vector.load %arg1[%c0_101, %c0_102] : memref<1x84xf32, #tpu.memory_space<vmem>>, vector<1x84xf32>
    %80 = vector.broadcast %79 : vector<1x84xf32> to vector<14x84xf32>
    %81 = arith.addf %78, %80 : vector<14x84xf32>
    %82 = vector.extract_strided_slice %81 {offsets = [0, 0], sizes = [10, 84], strides = [1, 1]} : vector<14x84xf32> to vector<10x84xf32>
    %c0_103 = arith.constant 0 : index
    %c0_104 = arith.constant 0 : index
    %c0_105 = arith.constant 0 : index
    %83 = vector.load %arg7[%c0_103, %c0_104, %c0_105] : memref<5x84x120xf32, #tpu.memory_space<vmem>>, vector<1x84x120xf32>
    %84 = vector.shape_cast %83 : vector<1x84x120xf32> to vector<84x120xf32>
    %cst_106 = arith.constant dense<0.000000e+00> : vector<10x120xf32>
    %85 = tpu.matmul %82, %84, %cst_106 {dimension_numbers = #tpu.dot_dimension_numbers<[1], [0], [0], [1], [0, 0, 1, 1], [], []>} : vector<10x84xf32>, vector<84x120xf32>, vector<10x120xf32> -> vector<10x120xf32>
    %c0_107 = arith.constant 0 : index
    %c0_108 = arith.constant 0 : index
    %86 = vector.load %arg13[%c0_107, %c0_108] : memref<10x120xf32, #tpu.memory_space<vmem>>, vector<10x120xf32>
    tpu.vector_store %arg13[%c0_107, %c0_108], %85 {strides = array<i32>} : memref<10x120xf32, #tpu.memory_space<vmem>>, vector<10x120xf32>,
    %c0_109 = arith.constant 0 : index
    %c0_110 = arith.constant 0 : index
    %87 = vector.load %arg13[%c0_109, %c0_110] : memref<10x120xf32, #tpu.memory_space<vmem>>, vector<10x120xf32>
    %88 = vector.extract_strided_slice %81 {offsets = [1, 0], sizes = [10, 84], strides = [1, 1]} : vector<14x84xf32> to vector<10x84xf32>
    %c1_111 = arith.constant 1 : index
    %c0_112 = arith.constant 0 : index
    %c0_113 = arith.constant 0 : index
    %89 = vector.load %arg7[%c1_111, %c0_112, %c0_113] : memref<5x84x120xf32, #tpu.memory_space<vmem>>, vector<1x84x120xf32>
    %90 = vector.shape_cast %89 : vector<1x84x120xf32> to vector<84x120xf32>
    %cst_114 = arith.constant dense<0.000000e+00> : vector<10x120xf32>
    %91 = tpu.matmul %88, %90, %cst_114 {dimension_numbers = #tpu.dot_dimension_numbers<[1], [0], [0], [1], [0, 0, 1, 1], [], []>} : vector<10x84xf32>, vector<84x120xf32>, vector<10x120xf32> -> vector<10x120xf32>
    %92 = arith.addf %87, %91 : vector<10x120xf32>
    %c0_115 = arith.constant 0 : index
    %c0_116 = arith.constant 0 : index
    %93 = vector.load %arg13[%c0_115, %c0_116] : memref<10x120xf32, #tpu.memory_space<vmem>>, vector<10x120xf32>
    tpu.vector_store %arg13[%c0_115, %c0_116], %92 {strides = array<i32>} : memref<10x120xf32, #tpu.memory_space<vmem>>, vector<10x120xf32>,
    %c0_117 = arith.constant 0 : index
    %c0_118 = arith.constant 0 : index
    %94 = vector.load %arg13[%c0_117, %c0_118] : memref<10x120xf32, #tpu.memory_space<vmem>>, vector<10x120xf32>
    %95 = vector.extract_strided_slice %81 {offsets = [2, 0], sizes = [10, 84], strides = [1, 1]} : vector<14x84xf32> to vector<10x84xf32>
    %c2_119 = arith.constant 2 : index
    %c0_120 = arith.constant 0 : index
    %c0_121 = arith.constant 0 : index
    %96 = vector.load %arg7[%c2_119, %c0_120, %c0_121] : memref<5x84x120xf32, #tpu.memory_space<vmem>>, vector<1x84x120xf32>
    %97 = vector.shape_cast %96 : vector<1x84x120xf32> to vector<84x120xf32>
    %cst_122 = arith.constant dense<0.000000e+00> : vector<10x120xf32>
    %98 = tpu.matmul %95, %97, %cst_122 {dimension_numbers = #tpu.dot_dimension_numbers<[1], [0], [0], [1], [0, 0, 1, 1], [], []>} : vector<10x84xf32>, vector<84x120xf32>, vector<10x120xf32> -> vector<10x120xf32>
    %99 = arith.addf %94, %98 : vector<10x120xf32>
    %c0_123 = arith.constant 0 : index
    %c0_124 = arith.constant 0 : index
    %100 = vector.load %arg13[%c0_123, %c0_124] : memref<10x120xf32, #tpu.memory_space<vmem>>, vector<10x120xf32>
    tpu.vector_store %arg13[%c0_123, %c0_124], %99 {strides = array<i32>} : memref<10x120xf32, #tpu.memory_space<vmem>>, vector<10x120xf32>,
    %c0_125 = arith.constant 0 : index
    %c0_126 = arith.constant 0 : index
    %101 = vector.load %arg13[%c0_125, %c0_126] : memref<10x120xf32, #tpu.memory_space<vmem>>, vector<10x120xf32>
    %102 = vector.extract_strided_slice %81 {offsets = [3, 0], sizes = [10, 84], strides = [1, 1]} : vector<14x84xf32> to vector<10x84xf32>
    %c3_127 = arith.constant 3 : index
    %c0_128 = arith.constant 0 : index
    %c0_129 = arith.constant 0 : index
    %103 = vector.load %arg7[%c3_127, %c0_128, %c0_129] : memref<5x84x120xf32, #tpu.memory_space<vmem>>, vector<1x84x120xf32>
    %104 = vector.shape_cast %103 : vector<1x84x120xf32> to vector<84x120xf32>
    %cst_130 = arith.constant dense<0.000000e+00> : vector<10x120xf32>
    %105 = tpu.matmul %102, %104, %cst_130 {dimension_numbers = #tpu.dot_dimension_numbers<[1], [0], [0], [1], [0, 0, 1, 1], [], []>} : vector<10x84xf32>, vector<84x120xf32>, vector<10x120xf32> -> vector<10x120xf32>
    %106 = arith.addf %101, %105 : vector<10x120xf32>
    %c0_131 = arith.constant 0 : index
    %c0_132 = arith.constant 0 : index
    %107 = vector.load %arg13[%c0_131, %c0_132] : memref<10x120xf32, #tpu.memory_space<vmem>>, vector<10x120xf32>
    tpu.vector_store %arg13[%c0_131, %c0_132], %106 {strides = array<i32>} : memref<10x120xf32, #tpu.memory_space<vmem>>, vector<10x120xf32>,
    %c0_133 = arith.constant 0 : index
    %c0_134 = arith.constant 0 : index
    %108 = vector.load %arg13[%c0_133, %c0_134] : memref<10x120xf32, #tpu.memory_space<vmem>>, vector<10x120xf32>
    %109 = vector.extract_strided_slice %81 {offsets = [4, 0], sizes = [10, 84], strides = [1, 1]} : vector<14x84xf32> to vector<10x84xf32>
    %c4_135 = arith.constant 4 : index
    %c0_136 = arith.constant 0 : index
    %c0_137 = arith.constant 0 : index
    %110 = vector.load %arg7[%c4_135, %c0_136, %c0_137] : memref<5x84x120xf32, #tpu.memory_space<vmem>>, vector<1x84x120xf32>
    %111 = vector.shape_cast %110 : vector<1x84x120xf32> to vector<84x120xf32>
    %cst_138 = arith.constant dense<0.000000e+00> : vector<10x120xf32>
    %112 = tpu.matmul %109, %111, %cst_138 {dimension_numbers = #tpu.dot_dimension_numbers<[1], [0], [0], [1], [0, 0, 1, 1], [], []>} : vector<10x84xf32>, vector<84x120xf32>, vector<10x120xf32> -> vector<10x120xf32>
    %113 = arith.addf %108, %112 : vector<10x120xf32>
    %c0_139 = arith.constant 0 : index
    %c0_140 = arith.constant 0 : index
    %114 = vector.load %arg13[%c0_139, %c0_140] : memref<10x120xf32, #tpu.memory_space<vmem>>, vector<10x120xf32>
    tpu.vector_store %arg13[%c0_139, %c0_140], %113 {strides = array<i32>} : memref<10x120xf32, #tpu.memory_space<vmem>>, vector<10x120xf32>,
    %c0_141 = arith.constant 0 : index
    %c0_142 = arith.constant 0 : index
    %115 = vector.load %arg8[%c0_141, %c0_142] : memref<5x9xf32, #tpu.memory_space<vmem>>, vector<5x9xf32>
    %c0_143 = arith.constant 0 : index
    %c0_144 = arith.constant 0 : index
    %116 = vector.load %arg9[%c0_143, %c0_144] : memref<119x60xf32, #tpu.memory_space<vmem>>, vector<119x60xf32>
    %c0_145 = arith.constant 0 : index
    %c0_146 = arith.constant 0 : index
    %117 = vector.load %arg13[%c0_145, %c0_146] : memref<10x120xf32, #tpu.memory_space<vmem>>, vector<9x119xf32>
    %c0_147 = arith.constant 0 : index
    %c1_148 = arith.constant 1 : index
    %118 = vector.load %arg13[%c0_147, %c1_148] : memref<10x120xf32, #tpu.memory_space<vmem>>, vector<9x119xf32>
    %119 = arith.maximumf %117, %118 : vector<9x119xf32>
    %c1_149 = arith.constant 1 : index
    %c0_150 = arith.constant 0 : index
    %120 = vector.load %arg13[%c1_149, %c0_150] : memref<10x120xf32, #tpu.memory_space<vmem>>, vector<9x119xf32>
    %c1_151 = arith.constant 1 : index
    %c1_152 = arith.constant 1 : index
    %121 = vector.load %arg13[%c1_151, %c1_152] : memref<10x120xf32, #tpu.memory_space<vmem>>, vector<9x119xf32>
    %122 = arith.maximumf %120, %121 : vector<9x119xf32>
    %123 = arith.maximumf %119, %122 : vector<9x119xf32>
    %cst_153 = arith.constant dense<0.000000e+00> : vector<5x119xf32>
    %124 = tpu.matmul %115, %123, %cst_153 {dimension_numbers = #tpu.dot_dimension_numbers<[1], [0], [0], [1], [0, 0, 1, 1], [], []>} : vector<5x9xf32>, vector<9x119xf32>, vector<5x119xf32> -> vector<5x119xf32>
    %cst_154 = arith.constant dense<0.000000e+00> : vector<5x60xf32>
    %125 = tpu.matmul %124, %116, %cst_154 {dimension_numbers = #tpu.dot_dimension_numbers<[1], [0], [0], [1], [0, 0, 1, 1], [], []>} : vector<5x119xf32>, vector<119x60xf32>, vector<5x60xf32> -> vector<5x60xf32>
    %c0_155 = arith.constant 0 : index
    %c0_156 = arith.constant 0 : index
    %126 = vector.load %arg2[%c0_155, %c0_156] : memref<1x60xf32, #tpu.memory_space<vmem>>, vector<1x60xf32>
    %127 = vector.broadcast %126 : vector<1x60xf32> to vector<5x60xf32>
    %128 = arith.addf %125, %127 : vector<5x60xf32>
    %c0_157 = arith.constant 0 : index
    %c0_158 = arith.constant 0 : index
    %129 = vector.load %arg3[%c0_157, %c0_158] : memref<1x128xf32, #tpu.memory_space<vmem>>, vector<1x128xf32>
    %130 = vector.extract_strided_slice %128 {offsets = [0, 0], sizes = [1, 60], strides = [1, 1]} : vector<5x60xf32> to vector<1x60xf32>
    %c0_159 = arith.constant 0 : index
    %c0_160 = arith.constant 0 : index
    %c0_161 = arith.constant 0 : index
    %131 = vector.load %arg10[%c0_159, %c0_160, %c0_161] : memref<5x60x128xf32, #tpu.memory_space<vmem>>, vector<1x60x128xf32>
    %132 = vector.shape_cast %131 : vector<1x60x128xf32> to vector<60x128xf32>
    %cst_162 = arith.constant dense<0.000000e+00> : vector<1x128xf32>
    %133 = tpu.matmul %130, %132, %cst_162 {dimension_numbers = #tpu.dot_dimension_numbers<[1], [0], [0], [1], [0, 0, 1, 1], [], []>} : vector<1x60xf32>, vector<60x128xf32>, vector<1x128xf32> -> vector<1x128xf32>
    %134 = arith.addf %129, %133 : vector<1x128xf32>
    %135 = vector.extract_strided_slice %128 {offsets = [1, 0], sizes = [1, 60], strides = [1, 1]} : vector<5x60xf32> to vector<1x60xf32>
    %c1_163 = arith.constant 1 : index
    %c0_164 = arith.constant 0 : index
    %c0_165 = arith.constant 0 : index
    %136 = vector.load %arg10[%c1_163, %c0_164, %c0_165] : memref<5x60x128xf32, #tpu.memory_space<vmem>>, vector<1x60x128xf32>
    %137 = vector.shape_cast %136 : vector<1x60x128xf32> to vector<60x128xf32>
    %cst_166 = arith.constant dense<0.000000e+00> : vector<1x128xf32>
    %138 = tpu.matmul %135, %137, %cst_166 {dimension_numbers = #tpu.dot_dimension_numbers<[1], [0], [0], [1], [0, 0, 1, 1], [], []>} : vector<1x60xf32>, vector<60x128xf32>, vector<1x128xf32> -> vector<1x128xf32>
    %139 = arith.addf %134, %138 : vector<1x128xf32>
    %140 = vector.extract_strided_slice %128 {offsets = [2, 0], sizes = [1, 60], strides = [1, 1]} : vector<5x60xf32> to vector<1x60xf32>
    %c2_167 = arith.constant 2 : index
    %c0_168 = arith.constant 0 : index
    %c0_169 = arith.constant 0 : index
    %141 = vector.load %arg10[%c2_167, %c0_168, %c0_169] : memref<5x60x128xf32, #tpu.memory_space<vmem>>, vector<1x60x128xf32>
    %142 = vector.shape_cast %141 : vector<1x60x128xf32> to vector<60x128xf32>
    %cst_170 = arith.constant dense<0.000000e+00> : vector<1x128xf32>
    %143 = tpu.matmul %140, %142, %cst_170 {dimension_numbers = #tpu.dot_dimension_numbers<[1], [0], [0], [1], [0, 0, 1, 1], [], []>} : vector<1x60xf32>, vector<60x128xf32>, vector<1x128xf32> -> vector<1x128xf32>
    %144 = arith.addf %139, %143 : vector<1x128xf32>
    %145 = vector.extract_strided_slice %128 {offsets = [3, 0], sizes = [1, 60], strides = [1, 1]} : vector<5x60xf32> to vector<1x60xf32>
    %c3_171 = arith.constant 3 : index
    %c0_172 = arith.constant 0 : index
    %c0_173 = arith.constant 0 : index
    %146 = vector.load %arg10[%c3_171, %c0_172, %c0_173] : memref<5x60x128xf32, #tpu.memory_space<vmem>>, vector<1x60x128xf32>
    %147 = vector.shape_cast %146 : vector<1x60x128xf32> to vector<60x128xf32>
    %cst_174 = arith.constant dense<0.000000e+00> : vector<1x128xf32>
    %148 = tpu.matmul %145, %147, %cst_174 {dimension_numbers = #tpu.dot_dimension_numbers<[1], [0], [0], [1], [0, 0, 1, 1], [], []>} : vector<1x60xf32>, vector<60x128xf32>, vector<1x128xf32> -> vector<1x128xf32>
    %149 = arith.addf %144, %148 : vector<1x128xf32>
    %150 = vector.extract_strided_slice %128 {offsets = [4, 0], sizes = [1, 60], strides = [1, 1]} : vector<5x60xf32> to vector<1x60xf32>
    %c4_175 = arith.constant 4 : index
    %c0_176 = arith.constant 0 : index
    %c0_177 = arith.constant 0 : index
    %151 = vector.load %arg10[%c4_175, %c0_176, %c0_177] : memref<5x60x128xf32, #tpu.memory_space<vmem>>, vector<1x60x128xf32>
    %152 = vector.shape_cast %151 : vector<1x60x128xf32> to vector<60x128xf32>
    %cst_178 = arith.constant dense<0.000000e+00> : vector<1x128xf32>
    %153 = tpu.matmul %150, %152, %cst_178 {dimension_numbers = #tpu.dot_dimension_numbers<[1], [0], [0], [1], [0, 0, 1, 1], [], []>} : vector<1x60xf32>, vector<60x128xf32>, vector<1x128xf32> -> vector<1x128xf32>
    %154 = arith.addf %149, %153 : vector<1x128xf32>
    %cst_179 = arith.constant 0.000000e+00 : f32
    %155 = vector.broadcast %cst_179 : f32 to vector<1x128xf32>
    %156 = arith.maximumf %154, %155 : vector<1x128xf32>
    %c0_180 = arith.constant 0 : index
    %c0_181 = arith.constant 0 : index
    %157 = vector.load %arg11[%c0_180, %c0_181] : memref<1x128xf32, #tpu.memory_space<vmem>>, vector<1x128xf32>
    tpu.vector_store %arg11[%c0_180, %c0_181], %156 {strides = array<i32>} : memref<1x128xf32, #tpu.memory_space<vmem>>, vector<1x128xf32>,
    return
  }
}

</mosaic_0001>

<bundles_post_ra>
// kernel: img_compression_forward.1
= control target key start
LH: loop header
LB: loop body
LE: loop exit
PB: predicated region body
PF: predicated region fallthrough
CT: control target
= control target key end

     0   :  { %vm66_vm0 = vcmask 1045504   ;;  %v3654_v6 = vmov 0.0   ;;  %vm53_vm1 = vcmask 310272   ;;  %s5002_s0 = inlined_call_operand.vmem [shape: f32[38,38], index: 0, kind: input, shape index: {}]   ;;  %s5003_s1 = inlined_call_operand.vmem [shape: f32[1,84], index: 1, kind: input, shape index: {}]   ;;  %s5004_s2 = inlined_call_operand.vmem [shape: f32[1,60], index: 2, kind: input, shape index: {}]   ;;  %s5005_s3 = inlined_call_operand.vmem [shape: f32[1,128], index: 3, kind: input, shape index: {}]   ;;  %s5006_s4 = inlined_call_operand.vmem [shape: f32[10,38,174], index: 4, kind: input, shape index: {}]   ;;  %s5007_s5 = inlined_call_operand.vmem [shape: f32[14,28], index: 5, kind: input, shape index: {}]   ;;  %s5008_s6 = inlined_call_operand.vmem [shape: f32[173,84], index: 6, kind: input, shape index: {}]   ;;  %s5009_s7 = inlined_call_operand.vmem [shape: f32[5,84,120], index: 7, kind: input, shape index: {}]   ;;  %s5010_s8 = inlined_call_operand.vmem [shape: f32[5,9], index: 8, kind: input, shape index: {}]   ;;  %s5011_s9 = inlined_call_operand.vmem [shape: f32[119,60], index: 9, kind: input, shape index: {}]   ;;  %s5012_s10 = inlined_call_operand.vmem [shape: f32[5,60,128], index: 10, kind: input, shape index: {}]   ;;  %s5013_s11 = inlined_call_operand.hbm [shape: f32[1,128], index: 11, kind: output, shape index: {}]  }
   0x1   :  { %v52_v0 = vld [vmem:[%s5006_s4 + $0x48] sm:$0x3f]  ;;  %v51_v1 = vld [vmem:[%s5006_s4 + $0x40] sm:$0x3f]  ;;  %v50_v2 = vld [vmem:[%s5006_s4 + $0x38] sm:$0xff]  ;;  %137 = vmatprep.mubr.f32.mxu0 %v3654_v6  ;;  %277 = vmatprep.mubr.f32.mxu1 %v3654_v6 }
   0x2   :  { %2975 = vmatprep.subr.msk.mxu0 %vm66_vm0, %v52_v0  ;;  %v49_v3 = vld [vmem:[%s5006_s4 + $0x30] sm:$0xff]  ;;  %v48_v4 = vld [vmem:[%s5006_s4 + $0x28] sm:$0xff]  ;;  %v2990_v5 = vld [vmem:[%s5006_s4 + $0x98] sm:$0x3f] }
   0x3   :  { %2976 = vmatpush1.msk.msra.mxu0 %vm66_vm0, %v51_v1  ;;  %v47_v7 = vld [vmem:[%s5006_s4 + $0x20] sm:$0xff]  ;;  %2991 = vmatprep.subr.msk.mxu1 %vm66_vm0, %v2990_v5  ;;  %v2989_v8 = vld [vmem:[%s5006_s4 + $0x90] sm:$0x3f]  ;;  %v2988_v9 = vld [vmem:[%s5006_s4 + $0x88] sm:$0xff] }
   0x4   :  { %97 = vmatprep.subr.mxu0 %v50_v2  ;;  %v46_v10 = vld [vmem:[%s5006_s4 + $0x18] sm:$0xff]  ;;  %2992 = vmatpush1.msk.msra.mxu1 %vm66_vm0, %v2989_v8  ;;  %v2987_v11 = vld [vmem:[%s5006_s4 + $0x80] sm:$0xff]  ;;  %v45_v12 = vld [vmem:[%s5006_s4 + $0x10] sm:$0xff] }
   0x5   :  { %98 = vmatpush1.msra.mxu0 %v49_v3  ;;  %237 = vmatprep.subr.mxu1 %v2988_v9  ;;  %v2986_v13 = vld [vmem:[%s5006_s4 + $0x78] sm:$0xff]  ;;  %v2985_v14 = vld [vmem:[%s5006_s4 + $0x70] sm:$0xff]  ;;  %v44_v15 = vld [vmem:[%s5006_s4 + $0x8] sm:$0xff] }
   0x6   :  { %99 = vmatprep.subr.mxu0 %v48_v4  ;;  %238 = vmatpush1.msra.mxu1 %v2987_v11  ;;  %v2984_v16 = vld [vmem:[%s5006_s4 + $0x68] sm:$0xff]  ;;  %v43_v17 = vld [vmem:[%s5006_s4] sm:$0xff]  ;;  %v2982_v20 = vld [vmem:[%s5006_s4 + $0x58] sm:$0xff] }
   0x7   :  { %100 = vmatpush1.msra.mxu0 %v47_v7  ;;  %239 = vmatprep.subr.mxu1 %v2986_v13  ;;  %v2983_v18 = vld [vmem:[%s5006_s4 + $0x60] sm:$0xff]  ;;  %v2981_v21 = vld [vmem:[%s5006_s4 + $0x50] sm:$0xff]  ;;  %v3006_v22 = vld [vmem:[%s5006_s4 + $0xe8] sm:$0x3f] }
   0x8   :  { %101 = vmatprep.subr.mxu0 %v46_v10  ;;  %v39_v19 = vld [vmem:[%s5002_s0] sm:$0xff]  ;;  %240 = vmatpush1.msra.mxu1 %v2985_v14  ;;  %v3800_v25 = vld [vmem:[%s5002_s0 + $0x8] sm:$0xff]  ;;  %v3004_v26 = vld [vmem:[%s5006_s4 + $0xd8] sm:$0xff] }
   0x9   :  { %102 = vmatpush1.msra.mxu0 %v45_v12  ;;  %241 = vmatprep.subr.mxu1 %v2984_v16  ;;  %v180_v23 = vld [vmem:[%s5002_s0 + $0x1] sm:$0xff]  ;;  %v3003_v27 = vld [vmem:[%s5006_s4 + $0xd0] sm:$0xff]  ;;  %v3022_v28 = vld [vmem:[%s5006_s4 + $0x138] sm:$0x3f] }
   0xa   :  { %103 = vmatprep.subr.mxu0 %v44_v15  ;;  %242 = vmatpush1.msra.mxu1 %v2983_v18  ;;  %v3005_v24 = vld [vmem:[%s5006_s4 + $0xe0] sm:$0x3f]  ;;  %v3820_v29 = vld [vmem:[%s5002_s0 + $0x9] sm:$0xff]  ;;  %v3000_v33 = vld [vmem:[%s5006_s4 + $0xb8] sm:$0xff] }
   0xb   :  { %104 = vmatpush1.msra.mxu0 %v43_v17  ;;  %243 = vmatprep.subr.mxu1 %v2982_v20  ;;  %v3002_v30 = vld [vmem:[%s5006_s4 + $0xc8] sm:$0xff]  ;;  %v3829_v31 = vld [vmem:[%s5002_s0 + $0x10] sm:$0xff]  ;;  %v3001_v32 = vld [vmem:[%s5006_s4 + $0xc0] sm:$0xff] }
   0xc   :  { %2977 = vmatmul.mubr.msk.f32.vlgmr.msra.gmra.mxu0 %vm53_vm1, %v39_v19  ;;  %244 = vmatpush1.msra.mxu1 %v2981_v21  ;;  %v3021_v34 = vld [vmem:[%s5006_s4 + $0x130] sm:$0x3f]  ;;  %v42_v37 = vld [vmem:[%s5002_s0 + $0x18] sm:$0x1f]  ;;  %v2998_v38 = vld [vmem:[%s5006_s4 + $0xa8] sm:$0xff] }
   0xd   :  { %143 = vmatprep.mubr.f32.mxu0 %v3654_v6  ;;  %3007 = vmatprep.subr.msk.mxu0 %vm66_vm0, %v3006_v22  ;;  %v2999_v35 = vld [vmem:[%s5006_s4 + $0xb0] sm:$0xff]  ;;  %v2997_v39 = vld [vmem:[%s5006_s4 + $0xa0] sm:$0xff]  ;;  %v3020_v40 = vld [vmem:[%s5006_s4 + $0x128] sm:$0xff] }
   0xe   :  { %2993 = vmatmul.mubr.msk.f32.vlgmr.msra.gmra.mxu1 %vm53_vm1, %v180_v23  ;;  %3008 = vmatpush1.msk.msra.mxu0 %vm66_vm0, %v3005_v24  ;;  %v3853_v36 = vld [vmem:[%s5002_s0 + $0x11] sm:$0xff]  ;;  %v183_v41 = vld [vmem:[%s5002_s0 + $0x19] sm:$0x1f]  ;;  %v3038_v42 = vld [vmem:[%s5006_s4 + $0x188] sm:$0x3f] }
   0xf   :  { %383 = vmatprep.subr.mxu0 %v3004_v26  ;;  %283 = vmatprep.mubr.f32.mxu1 %v3654_v6  ;;  %v326_v43 = vld [vmem:[%s5002_s0 + $0x2] sm:$0xff]  ;;  %v3018_v45 = vld [vmem:[%s5006_s4 + $0x118] sm:$0xff]  ;;  %v3017_v46 = vld [vmem:[%s5006_s4 + $0x110] sm:$0xff] }
  0x10   :  { %2978 = vmatmul.mubr.msk.f32.gmra.mxu0 %vm53_vm1, %v3800_v25  ;;  %3023 = vmatprep.subr.msk.mxu1 %vm66_vm0, %v3022_v28  ;;  %v3019_v44 = vld [vmem:[%s5006_s4 + $0x120] sm:$0xff]  ;;  %v3016_v47 = vld [vmem:[%s5006_s4 + $0x108] sm:$0xff]  ;;  %v3014_v51 = vld [vmem:[%s5006_s4 + $0xf8] sm:$0xff] }
  0x11   :  { %149 = vmatprep.mubr.f32.mxu0 %v3654_v6  ;;  %384 = vmatpush1.msra.mxu0 %v3003_v27  ;;  %v3037_v48 = vld [vmem:[%s5006_s4 + $0x180] sm:$0x3f]  ;;  %v327_v49 = vld [vmem:[%s5002_s0 + $0xa] sm:$0xff]  ;;  %v3036_v53 = vld [vmem:[%s5006_s4 + $0x178] sm:$0xff] }
  0x12   :  { %2994 = vmatmul.mubr.msk.f32.gmra.mxu1 %vm53_vm1, %v3820_v29  ;;  %385 = vmatprep.subr.mxu0 %v3002_v30  ;;  %v3015_v50 = vld [vmem:[%s5006_s4 + $0x100] sm:$0xff]  ;;  %v3013_v52 = vld [vmem:[%s5006_s4 + $0xf0] sm:$0xff]  ;;  %v3034_v57 = vld [vmem:[%s5006_s4 + $0x168] sm:$0xff] }
  0x13   :  { %289 = vmatprep.mubr.f32.mxu1 %v3654_v6  ;;  %386 = vmatpush1.msra.mxu0 %v3001_v32  ;;  %v472_v54 = vld [vmem:[%s5002_s0 + $0x3] sm:$0xff]  ;;  %v3035_v55 = vld [vmem:[%s5006_s4 + $0x170] sm:$0xff]  ;;  %v3054_v59 = vld [vmem:[%s5006_s4 + $0x1d8] sm:$0x3f] }
  0x14   :  { %2979 = vmatmul.mubr.msk.f32.gmra.mxu0 %vm53_vm1, %v3829_v31  ;;  %387 = vmatprep.subr.mxu0 %v3000_v33  ;;  %v328_v56 = vld [vmem:[%s5002_s0 + $0x12] sm:$0xff]  ;;  %v3033_v58 = vld [vmem:[%s5006_s4 + $0x160] sm:$0xff]  ;;  %v329_v62 = vld [vmem:[%s5002_s0 + $0x1a] sm:$0x1f] }
  0x15   :  { %155 = vmatprep.mubr.f32.mxu0 %v3654_v6  ;;  %3024 = vmatpush1.msk.msra.mxu1 %vm66_vm0, %v3021_v34  ;;  %v473_v60 = vld [vmem:[%s5002_s0 + $0xb] sm:$0xff]  ;;  %v3032_v61 = vld [vmem:[%s5006_s4 + $0x158] sm:$0xff]  ;;  %v3029_v3 = vld [vmem:[%s5006_s4 + $0x140] sm:$0xff] }
  0x16   :  { %388 = vmatpush1.msra.mxu0 %v2999_v35  ;;  %2995 = vmatmul.mubr.msk.f32.gmra.mxu1 %vm53_vm1, %v3853_v36  ;;  %v3031_v63 = vld [vmem:[%s5006_s4 + $0x150] sm:$0xff]  ;;  %v3030_v0 = vld [vmem:[%s5006_s4 + $0x148] sm:$0xff]  ;;  %v3051_v7 = vld [vmem:[%s5006_s4 + $0x1c0] sm:$0xff] }
  0x17   :  { %389 = vmatprep.subr.mxu0 %v2998_v38  ;;  %295 = vmatprep.mubr.f32.mxu1 %v3654_v6  ;;  %v3053_v1 = vld [vmem:[%s5006_s4 + $0x1d0] sm:$0x3f]  ;;  %v618_v4 = vld [vmem:[%s5002_s0 + $0x4] sm:$0xff]  ;;  %v475_v9 = vld [vmem:[%s5002_s0 + $0x1b] sm:$0x1f] }
  0x18   :  { %2980 = vmatmul.mubr.msk.f32.gmra.mxu0 %vm53_vm1, %v42_v37  ;;  %529 = vmatprep.subr.mxu1 %v3020_v40  ;;  %v474_v2 = vld [vmem:[%s5002_s0 + $0x13] sm:$0xff]  ;;  %v3052_v5 = vld [vmem:[%s5006_s4 + $0x1c8] sm:$0xff] }
  0x19   :  { %390 = vmatpush1.msra.mxu0 %v2997_v39  ;;  %423 = vmatprep.mubr.f32.mxu0 %v3654_v6  ;;  %v3070_v8 = vld [vmem:[%s5006_s4 + $0x228] sm:$0x3f]  ;;  %v3050_v10 = vld [vmem:[%s5006_s4 + $0x1b8] sm:$0xff]  ;;  %v3049_v12 = vld [vmem:[%s5006_s4 + $0x1b0] sm:$0xff] }
  0x1a   :  { %2996 = vmatmul.mubr.msk.f32.gmra.mxu1 %vm53_vm1, %v183_v41  ;;  %3039 = vmatprep.subr.msk.mxu0 %vm66_vm0, %v3038_v42  ;;  %v619_v11 = vld [vmem:[%s5002_s0 + $0xc] sm:$0xff] }
  0x1b   :  { %530 = vmatpush1.msra.mxu1 %v3019_v44  ;;  %569 = vmatprep.mubr.f32.mxu1 %v3654_v6  ;;  %v3048_v13 = vld [vmem:[%s5006_s4 + $0x1a8] sm:$0xff] }
  0x1c   :  { %3009 = vmatmul.mubr.msk.f32.vlgmr.msra.gmra.mxu0 %vm53_vm1, %v326_v43  ;;  %531 = vmatprep.subr.mxu1 %v3018_v45 }
  0x1d   :  { %429 = vmatprep.mubr.f32.mxu0 %v3654_v6  ;;  %532 = vmatpush1.msra.mxu1 %v3017_v46 }
  0x1e   :  { %533 = vmatprep.subr.mxu1 %v3016_v47  ;;  %3040 = vmatpush1.msk.msra.mxu0 %vm66_vm0, %v3037_v48 }
  0x1f   :  { %534 = vmatpush1.msra.mxu1 %v3015_v50  ;;  %675 = vmatprep.subr.mxu0 %v3036_v53 }
  0x20   :  { %3010 = vmatmul.mubr.msk.f32.gmra.mxu0 %vm53_vm1, %v327_v49  ;;  %535 = vmatprep.subr.mxu1 %v3014_v51 }
  0x21   :  { %435 = vmatprep.mubr.f32.mxu0 %v3654_v6  ;;  %536 = vmatpush1.msra.mxu1 %v3013_v52 }
  0x22   :  { %3025 = vmatmul.mubr.msk.f32.vlgmr.msra.gmra.mxu1 %vm53_vm1, %v472_v54  ;;  %676 = vmatpush1.msra.mxu0 %v3035_v55 }
  0x23   :  { %575 = vmatprep.mubr.f32.mxu1 %v3654_v6  ;;  %677 = vmatprep.subr.mxu0 %v3034_v57 }
  0x24   :  { %3011 = vmatmul.mubr.msk.f32.gmra.mxu0 %vm53_vm1, %v328_v56  ;;  %3055 = vmatprep.subr.msk.mxu1 %vm66_vm0, %v3054_v59 }
  0x25   :  { %441 = vmatprep.mubr.f32.mxu0 %v3654_v6  ;;  %678 = vmatpush1.msra.mxu0 %v3033_v58 }
  0x26   :  { %3026 = vmatmul.mubr.msk.f32.gmra.mxu1 %vm53_vm1, %v473_v60  ;;  %679 = vmatprep.subr.mxu0 %v3032_v61 }
  0x27   :  { %581 = vmatprep.mubr.f32.mxu1 %v3654_v6  ;;  %680 = vmatpush1.msra.mxu0 %v3031_v63 }
  0x28   :  { %3012 = vmatmul.mubr.msk.f32.gmra.mxu0 %vm53_vm1, %v329_v62  ;;  %681 = vmatprep.subr.mxu0 %v3030_v0 }
  0x29   :  { %715 = vmatprep.mubr.f32.mxu0 %v3654_v6  ;;  %3056 = vmatpush1.msk.msra.mxu1 %vm66_vm0, %v3053_v1 }
  0x2a   :  { %3027 = vmatmul.mubr.msk.f32.gmra.mxu1 %vm53_vm1, %v474_v2  ;;  %682 = vmatpush1.msra.mxu0 %v3029_v3 }
  0x2b   :  { %587 = vmatprep.mubr.f32.mxu1 %v3654_v6  ;;  %821 = vmatprep.subr.mxu1 %v3052_v5 }
  0x2c   :  { %3041 = vmatmul.mubr.msk.f32.vlgmr.msra.gmra.mxu0 %vm53_vm1, %v618_v4  ;;  %822 = vmatpush1.msra.mxu1 %v3051_v7 }
  0x2d   :  { %721 = vmatprep.mubr.f32.mxu0 %v3654_v6  ;;  %3071 = vmatprep.subr.msk.mxu0 %vm66_vm0, %v3070_v8 }
  0x2e   :  { %16 = vsyncpa [#allocation5], 0  ;;  %3028 = vmatmul.mubr.msk.f32.gmra.mxu1 %vm53_vm1, %v475_v9  ;;  %823 = vmatprep.subr.mxu1 %v3050_v10  ;;  %v3047_v14 = vld [vmem:[%s5006_s4 + $0x1a0] sm:$0xff]  ;;  %v3046_v15 = vld [vmem:[%s5006_s4 + $0x198] sm:$0xff]  ;;  %vm163_vm2 = vcmask 375808   ;;  %vm170_vm3 = vcmask 372736  }
  0x2f   :  { %824 = vmatpush1.msra.mxu1 %v3049_v12  ;;  %v3069_v16 = vld [vmem:[%s5006_s4 + $0x220] sm:$0x3f]  ;;  %v620_v17 = vld [vmem:[%s5002_s0 + $0x14] sm:$0xff]  ;;  %861 = vmatprep.mubr.f32.mxu1 %v3654_v6  ;;  %v3066_v24 = vld [vmem:[%s5006_s4 + $0x208] sm:$0xff]  ;;  %vm1733_vm4 = vcmask 1044480   ;;  %vm1542_vm5 = vcmask 1039360  }
  0x30   :  { %3042 = vmatmul.mubr.msk.f32.gmra.mxu0 %vm53_vm1, %v619_v11  ;;  %825 = vmatprep.subr.mxu1 %v3048_v13  ;;  %v3045_v18 = vld [vmem:[%s5006_s4 + $0x190] sm:$0xff]  ;;  %v764_v19 = vld [vmem:[%s5002_s0 + $0x5] sm:$0xff]  ;;  %v3068_v20 = vld [vmem:[%s5006_s4 + $0x218] sm:$0xff]  ;;  %vm1597_vm6 = vcmask 1046528   ;;  %vm1635_vm7 = vcmask 1043456   ;;  %vm1628_vm8 = vcmask 228352  }
  0x31   :  { %727 = vmatprep.mubr.f32.mxu0 %v3654_v6  ;;  %826 = vmatpush1.msra.mxu1 %v3047_v14  ;;  %v3067_v21 = vld [vmem:[%s5006_s4 + $0x210] sm:$0xff]  ;;  %v3086_v22 = vld [vmem:[%s5006_s4 + $0x278] sm:$0x3f]  ;;  %v3065_v27 = vld [vmem:[%s5006_s4 + $0x200] sm:$0xff]  ;;  %vm1726_vm9 = vcmask 367616   ;;  %vm1823_vm10 = vcmask 687104  }
  0x32   :  { %827 = vmatprep.subr.mxu1 %v3046_v15  ;;  %3072 = vmatpush1.msk.msra.mxu0 %vm66_vm0, %v3069_v16  ;;  %v621_v23 = vld [vmem:[%s5002_s0 + $0x1c] sm:$0x1f]  ;;  %v765_v26 = vld [vmem:[%s5002_s0 + $0xd] sm:$0xff]  ;;  %v1351_v11 = vld [vmem:[%s5002_s0 + $0x21] sm:$0x1f]  ;;  %vm1910_vm11 = vcmask 975872  }
  0x33   :  { %828 = vmatpush1.msra.mxu1 %v3045_v18  ;;  %967 = vmatprep.subr.mxu0 %v3068_v20  ;;  %v3064_v28 = vld [vmem:[%s5006_s4 + $0x1f8] sm:$0xff]  ;;  %v3063_v30 = vld [vmem:[%s5006_s4 + $0x1f0] sm:$0xff]  ;;  %v3062_v32 = vld [vmem:[%s5006_s4 + $0x1e8] sm:$0xff]  ;;  %vm1908_vm12 = vcmask 982016   ;;  %vm3656_vm13 = vmmov 0   ;;  %vm2370_vm14 = vcmask 1040384  }
  0x34   :  { %3043 = vmatmul.mubr.msk.f32.gmra.mxu0 %vm53_vm1, %v620_v17  ;;  %3057 = vmatmul.mubr.msk.f32.vlgmr.msra.gmra.mxu1 %vm53_vm1, %v764_v19  ;;  %v3085_v33 = vld [vmem:[%s5006_s4 + $0x270] sm:$0x3f]  ;;  %v3061_v35 = vld [vmem:[%s5006_s4 + $0x1e0] sm:$0xff]  ;;  %v3084_v38 = vld [vmem:[%s5006_s4 + $0x268] sm:$0xff]  ;;  %vm2366_vm15 = vcmask 72704  }
  0x35   :  { %733 = vmatprep.mubr.f32.mxu0 %v3654_v6  ;;  %867 = vmatprep.mubr.f32.mxu1 %v3654_v6  ;;  %v766_v34 = vld [vmem:[%s5002_s0 + $0x15] sm:$0xff]  ;;  %v910_v37 = vld [vmem:[%s5002_s0 + $0x6] sm:$0xff]  ;;  %v767_v41 = vld [vmem:[%s5002_s0 + $0x1d] sm:$0x1f] }
  0x36   :  { %968 = vmatpush1.msra.mxu0 %v3067_v21  ;;  %3087 = vmatprep.subr.msk.mxu1 %vm66_vm0, %v3086_v22  ;;  %v3083_v39 = vld [vmem:[%s5006_s4 + $0x260] sm:$0xff]  ;;  %v3102_v40 = vld [vmem:[%s5006_s4 + $0x2c8] sm:$0x3f]  ;;  %v3082_v42 = vld [vmem:[%s5006_s4 + $0x258] sm:$0xff] }
  0x37   :  { %969 = vmatprep.subr.mxu0 %v3066_v24  ;;  %3088 = vmatpush1.msk.msra.mxu1 %vm66_vm0, %v3085_v33  ;;  %v911_v43 = vld [vmem:[%s5002_s0 + $0xe] sm:$0xff]  ;;  %v3079_v46 = vld [vmem:[%s5006_s4 + $0x240] sm:$0xff]  ;;  %v3078_v47 = vld [vmem:[%s5006_s4 + $0x238] sm:$0xff] }
  0x38   :  { %3044 = vmatmul.mubr.msk.f32.gmra.mxu0 %vm53_vm1, %v621_v23  ;;  %3058 = vmatmul.mubr.msk.f32.gmra.mxu1 %vm53_vm1, %v765_v26  ;;  %v3081_v44 = vld [vmem:[%s5006_s4 + $0x250] sm:$0xff]  ;;  %v3080_v45 = vld [vmem:[%s5006_s4 + $0x248] sm:$0xff]  ;;  %v3101_v48 = vld [vmem:[%s5006_s4 + $0x2c0] sm:$0x3f] }
  0x39   :  { %970 = vmatpush1.msra.mxu0 %v3065_v27  ;;  %873 = vmatprep.mubr.f32.mxu1 %v3654_v6  ;;  %v912_v49 = vld [vmem:[%s5002_s0 + $0x16] sm:$0xff]  ;;  %v1056_v51 = vld [vmem:[%s5002_s0 + $0x7] sm:$0xff]  ;;  %v913_v55 = vld [vmem:[%s5002_s0 + $0x1e] sm:$0x1f] }
  0x3a   :  { %971 = vmatprep.subr.mxu0 %v3064_v28  ;;  %1007 = vmatprep.mubr.f32.mxu0 %v3654_v6  ;;  %v3077_v50 = vld [vmem:[%s5006_s4 + $0x230] sm:$0xff]  ;;  %v3100_v52 = vld [vmem:[%s5006_s4 + $0x2b8] sm:$0xff]  ;;  %v3098_v56 = vld [vmem:[%s5006_s4 + $0x2a8] sm:$0xff] }
  0x3b   :  { %972 = vmatpush1.msra.mxu0 %v3063_v30  ;;  %1113 = vmatprep.subr.mxu1 %v3084_v38  ;;  %v3099_v53 = vld [vmem:[%s5006_s4 + $0x2b0] sm:$0xff]  ;;  %v3118_v54 = vld [vmem:[%s5006_s4 + $0x318] sm:$0x3f]  ;;  %v3097_v58 = vld [vmem:[%s5006_s4 + $0x2a0] sm:$0xff] }
  0x3c   :  { %973 = vmatprep.subr.mxu0 %v3062_v32  ;;  %3059 = vmatmul.mubr.msk.f32.gmra.mxu1 %vm53_vm1, %v766_v34  ;;  %v1057_v57 = vld [vmem:[%s5002_s0 + $0xf] sm:$0xff]  ;;  %v3096_v59 = vld [vmem:[%s5006_s4 + $0x298] sm:$0xff]  ;;  %v3093_v0 = vld [vmem:[%s5006_s4 + $0x280] sm:$0xff] }
  0x3d   :  { %974 = vmatpush1.msra.mxu0 %v3061_v35  ;;  %879 = vmatprep.mubr.f32.mxu1 %v3654_v6  ;;  %v3095_v60 = vld [vmem:[%s5006_s4 + $0x290] sm:$0xff]  ;;  %v3094_v61 = vld [vmem:[%s5006_s4 + $0x288] sm:$0xff]  ;;  %v3115_v2 = vld [vmem:[%s5006_s4 + $0x300] sm:$0xff] }
  0x3e   :  { %3073 = vmatmul.mubr.msk.f32.vlgmr.msra.gmra.mxu0 %vm53_vm1, %v910_v37  ;;  %1114 = vmatpush1.msra.mxu1 %v3083_v39  ;;  %v3117_v62 = vld [vmem:[%s5006_s4 + $0x310] sm:$0x3f]  ;;  %v1058_v63 = vld [vmem:[%s5002_s0 + $0x17] sm:$0xff]  ;;  %v3116_v1 = vld [vmem:[%s5006_s4 + $0x308] sm:$0xff] }
  0x3f   :  { %1013 = vmatprep.mubr.f32.mxu0 %v3654_v6  ;;  %3103 = vmatprep.subr.msk.mxu0 %vm66_vm0, %v3102_v40  ;;  %v1059_v3 = vld [vmem:[%s5002_s0 + $0x1f] sm:$0x1f]  ;;  %v3113_v5 = vld [vmem:[%s5006_s4 + $0x2f0] sm:$0xff] }
  0x40   :  { %3060 = vmatmul.mubr.msk.f32.gmra.mxu1 %vm53_vm1, %v767_v41  ;;  %1115 = vmatprep.subr.mxu1 %v3082_v42  ;;  %v3114_v4 = vld [vmem:[%s5006_s4 + $0x2f8] sm:$0xff]  ;;  %v3111_v7 = vld [vmem:[%s5006_s4 + $0x2e0] sm:$0xff]  ;;  %v3109_v10 = vld [vmem:[%s5006_s4 + $0x2d0] sm:$0xff] }
  0x41   :  { %1116 = vmatpush1.msra.mxu1 %v3081_v44  ;;  %1153 = vmatprep.mubr.f32.mxu1 %v3654_v6  ;;  %v3110_v8 = vld [vmem:[%s5006_s4 + $0x2d8] sm:$0xff] }
  0x42   :  { %3074 = vmatmul.mubr.msk.f32.gmra.mxu0 %vm53_vm1, %v911_v43  ;;  %1117 = vmatprep.subr.mxu1 %v3080_v45  ;;  %v1204_v9 = vld [vmem:[%s5002_s0 + $0x18] sm:$0xff] }
  0x43   :  { %1019 = vmatprep.mubr.f32.mxu0 %v3654_v6  ;;  %1118 = vmatpush1.msra.mxu1 %v3079_v46 }
  0x44   :  { %1119 = vmatprep.subr.mxu1 %v3078_v47  ;;  %3104 = vmatpush1.msk.msra.mxu0 %vm66_vm0, %v3101_v48 }
  0x45   :  { %1120 = vmatpush1.msra.mxu1 %v3077_v50  ;;  %1259 = vmatprep.subr.mxu0 %v3100_v52 }
  0x46   :  { %3075 = vmatmul.mubr.msk.f32.gmra.mxu0 %vm53_vm1, %v912_v49  ;;  %3089 = vmatmul.mubr.msk.f32.vlgmr.msra.gmra.mxu1 %vm53_vm1, %v1056_v51 }
  0x47   :  { %1025 = vmatprep.mubr.f32.mxu0 %v3654_v6  ;;  %1159 = vmatprep.mubr.f32.mxu1 %v3654_v6 }
  0x48   :  { %1260 = vmatpush1.msra.mxu0 %v3099_v53  ;;  %3119 = vmatprep.subr.msk.mxu1 %vm66_vm0, %v3118_v54 }
  0x49   :  { %1261 = vmatprep.subr.mxu0 %v3098_v56  ;;  %3120 = vmatpush1.msk.msra.mxu1 %vm66_vm0, %v3117_v62 }
  0x4a   :  { %3076 = vmatmul.mubr.msk.f32.gmra.mxu0 %vm53_vm1, %v913_v55  ;;  %3090 = vmatmul.mubr.msk.f32.gmra.mxu1 %vm53_vm1, %v1057_v57 }
  0x4b   :  { %1262 = vmatpush1.msra.mxu0 %v3097_v58  ;;  %1165 = vmatprep.mubr.f32.mxu1 %v3654_v6 }
  0x4c   :  { %1263 = vmatprep.subr.mxu0 %v3096_v59  ;;  %1299 = vmatprep.mubr.f32.mxu0 %v3654_v6 }
  0x4d   :  { %1264 = vmatpush1.msra.mxu0 %v3095_v60  ;;  %1405 = vmatprep.subr.mxu1 %v3116_v1 }
  0x4e   :  { %1265 = vmatprep.subr.mxu0 %v3094_v61  ;;  %3091 = vmatmul.mubr.msk.f32.gmra.mxu1 %vm53_vm1, %v1058_v63 }
  0x4f   :  { %1266 = vmatpush1.msra.mxu0 %v3093_v0  ;;  %1171 = vmatprep.mubr.f32.mxu1 %v3654_v6 }
  0x50   :  { %3105 = vmatmul.mubr.msk.f32.vlgmr.msra.gmra.mxu0 %vm53_vm1, %v3800_v25  ;;  %1406 = vmatpush1.msra.mxu1 %v3115_v2  ;;  %v3112_v25 = vld [vmem:[%s5006_s4 + $0x2e8] sm:$0xff] }
  0x51   :  { %1305 = vmatprep.mubr.f32.mxu0 %v3654_v6  ;;  %1407 = vmatprep.subr.mxu1 %v3114_v4 }
  0x52   :  { %3092 = vmatmul.mubr.msk.f32.gmra.mxu1 %vm53_vm1, %v1059_v3 }
  0x53   :  { %1408 = vmatpush1.msra.mxu1 %v3113_v5  ;;  %1445 = vmatprep.mubr.f32.mxu1 %v3654_v6 }
  0x54   :  { %3106 = vmatmul.mubr.msk.f32.gmra.mxu0 %vm53_vm1, %v3829_v31  ;;  %1409 = vmatprep.subr.mxu1 %v3112_v25  ;;  %v1205_v31 = vld [vmem:[%s5002_s0 + $0x20] sm:$0x1f] }
  0x55   :  { %1311 = vmatprep.mubr.f32.mxu0 %v3654_v6  ;;  %1410 = vmatpush1.msra.mxu1 %v3111_v7 }
  0x56   :  { %1411 = vmatprep.subr.mxu1 %v3110_v8 }
  0x57   :  { %1412 = vmatpush1.msra.mxu1 %v3109_v10 }
  0x58   :  { %3107 = vmatmul.mubr.msk.f32.gmra.mxu0 %vm53_vm1, %v1204_v9  ;;  %3121 = vmatmul.mubr.msk.f32.vlgmr.msra.gmra.mxu1 %vm53_vm1, %v3820_v29  ;;  %v1350_v29 = vld [vmem:[%s5002_s0 + $0x19] sm:$0xff]  ;;  %s3655_s0 = smov 127  }
  0x59   :  { %1317 = vmatprep.mubr.f32.mxu0 %v3654_v6  ;;  %1451 = vmatprep.mubr.f32.mxu1 %v3654_v6 }
  0x5a   :  { %1737 = vmatprep.subr.mxu1 %v3654_v6 }
  0x5c   :  { %3108 = vmatmul.mubr.msk.f32.gmra.mxu0 %vm53_vm1, %v1205_v31  ;;  %3122 = vmatmul.mubr.msk.f32.gmra.mxu1 %vm53_vm1, %v3853_v36 }
  0x5d   :  { %1706 = vmatprep.mubr.f32.mxu0 %v3654_v6  ;;  %1457 = vmatprep.mubr.f32.mxu1 %v3654_v6 }
  0x60   :  { %3123 = vmatmul.mubr.msk.f32.gmra.mxu1 %vm53_vm1, %v1350_v29 }
  0x61   :  { %1463 = vmatprep.mubr.f32.mxu1 %v3654_v6 }
  0x64   :  { %3124 = vmatmul.mubr.msk.f32.gmra.mxu1 %vm53_vm1, %v1351_v11  ;;  %vm2537_vm1 = vcmask 490496  }
  0xcc   :  { %v4244_v12 = vpop.f32.mrf.mxu0 }
  0xce   :  { %v141_v36 = vpop.f32.mrf.mxu0  ;;  %v4247_v13 = vpop.f32.mrf.mxu1 }
  0xcf   :  { %164 = vst.msk [vmem:[#allocation2 + $0x8] sm:$0xff] %vm163_vm2, %v141_v36 }
  0xd0   :  { %v4249_v14 = vpop.f32.mrf.mxu0  ;;  %v281_v15 = vpop.f32.mrf.mxu1 }
  0xd2   :  { %v147_v16 = vpop.f32.mrf.mxu0  ;;  %v4252_v17 = vpop.f32.mrf.mxu1 }
  0xd3   :  { %166 = vst.msk [vmem:[#allocation2 + $0x18] sm:$0xff] %vm163_vm2, %v147_v16 }
  0xd4   :  { %v4254_v18 = vpop.f32.mrf.mxu0  ;;  %v287_v19 = vpop.f32.mrf.mxu1 }
  0xd6   :  { %v173_v20 = vld [vmem:[#allocation2 + $0x8] sm:$0xff]  ;;  %v153_v21 = vpop.f32.mrf.mxu0  ;;  %v4257_v23 = vpop.f32.mrf.mxu1 }
  0xd7   :  { %v303_v22 = vadd.f32 %v281_v15, %v173_v20  ;;  %168 = vst.msk [vmem:[#allocation2 + $0x28] sm:$0xff] %vm163_vm2, %v153_v21 }
  0xd8   :  { %v157_v24 = vpop.f32.mrf.mxu0  ;;  %v293_v26 = vpop.f32.mrf.mxu1 }
  0xd9   :  { %311 = vst.msk [vmem:[#allocation2 + $0x8] sm:$0xff] %vm163_vm2, %v303_v22  ;;  %169 = vst [vmem:[#allocation2 + $0x30] sm:$0x1f] %v157_v24 }
  0xda   :  { %v175_v27 = vld [vmem:[#allocation2 + $0x18] sm:$0xff]  ;;  %v159_v28 = vpop.f32.mrf.mxu0  ;;  %v297_v32 = vpop.f32.mrf.mxu1 }
  0xdb   :  { %v305_v30 = vadd.f32 %v287_v19, %v175_v27  ;;  %171 = vst.msk [vmem:[#allocation2 + $0x38] sm:$0x1f] %vm170_vm3, %v159_v28 }
  0xdc   :  { %v4261_v33 = vpop.f32.mrf.mxu0  ;;  %v299_v38 = vpop.f32.mrf.mxu1 }
  0xdd   :  { %313 = vst.msk [vmem:[#allocation2 + $0x18] sm:$0xff] %vm163_vm2, %v305_v30 }
  0xde   :  { %v177_v34 = vld [vmem:[#allocation2 + $0x28] sm:$0xff]  ;;  %v427_v35 = vpop.f32.mrf.mxu0 }
  0xdf   :  { %v307_v37 = vadd.f32 %v293_v26, %v177_v34 }
  0xe0   :  { %v178_v39 = vld [vmem:[#allocation2 + $0x30] sm:$0x1f]  ;;  %v319_v40 = vld [vmem:[#allocation2 + $0x8] sm:$0xff]  ;;  %v4264_v41 = vpop.f32.mrf.mxu0 }
  0xe1   :  { %315 = vst.msk [vmem:[#allocation2 + $0x28] sm:$0xff] %vm163_vm2, %v307_v37  ;;  %v308_v42 = vadd.f32 %v297_v32, %v178_v39  ;;  %v449_v43 = vadd.f32 %v427_v35, %v319_v40 }
  0xe2   :  { %v179_v44 = vld [vmem:[#allocation2 + $0x38] sm:$0x1f]  ;;  %v433_v45 = vpop.f32.mrf.mxu0  ;;  %v4268_v47 = vpop.f32.mrf.mxu1 }
  0xe3   :  { %316 = vst [vmem:[#allocation2 + $0x30] sm:$0x1f] %v308_v42  ;;  %457 = vst.msk [vmem:[#allocation2 + $0x8] sm:$0xff] %vm163_vm2, %v449_v43  ;;  %v309_v46 = vadd.f32 %v299_v38, %v179_v44 }
  0xe4   :  { %v321_v48 = vld [vmem:[#allocation2 + $0x18] sm:$0xff]  ;;  %v4270_v49 = vpop.f32.mrf.mxu0  ;;  %v573_v51 = vpop.f32.mrf.mxu1 }
  0xe5   :  { %317 = vst.msk [vmem:[#allocation2 + $0x38] sm:$0x1f] %vm170_vm3, %v309_v46  ;;  %v451_v50 = vadd.f32 %v433_v45, %v321_v48 }
  0xe6   :  { %v439_v52 = vpop.f32.mrf.mxu0  ;;  %v4274_v53 = vpop.f32.mrf.mxu1 }
  0xe7   :  { %459 = vst.msk [vmem:[#allocation2 + $0x18] sm:$0xff] %vm163_vm2, %v451_v50 }
  0xe8   :  { %v323_v54 = vld [vmem:[#allocation2 + $0x28] sm:$0xff]  ;;  %v443_v55 = vpop.f32.mrf.mxu0  ;;  %v579_v57 = vpop.f32.mrf.mxu1 }
  0xe9   :  { %v453_v56 = vadd.f32 %v439_v52, %v323_v54  ;;  %v302_v54 = vadd.f32 %v4247_v13, %v4244_v12 }
  0xea   :  { %v324_v58 = vld [vmem:[#allocation2 + $0x30] sm:$0x1f]  ;;  %v465_v59 = vld [vmem:[#allocation2 + $0x8] sm:$0xff]  ;;  %v445_v60 = vpop.f32.mrf.mxu0  ;;  %v4277_v63 = vpop.f32.mrf.mxu1 }
  0xeb   :  { %461 = vst.msk [vmem:[#allocation2 + $0x28] sm:$0xff] %vm163_vm2, %v453_v56  ;;  %v454_v61 = vadd.f32 %v443_v55, %v324_v58  ;;  %v595_v62 = vadd.f32 %v573_v51, %v465_v59  ;;  %v448_v59 = vadd.f32 %v4261_v33, %v302_v54 }
  0xec   :  { %v325_v0 = vld [vmem:[#allocation2 + $0x38] sm:$0x1f]  ;;  %v4279_v1 = vpop.f32.mrf.mxu0  ;;  %v585_v3 = vpop.f32.mrf.mxu1 }
  0xed   :  { %462 = vst [vmem:[#allocation2 + $0x30] sm:$0x1f] %v454_v61  ;;  %603 = vst.msk [vmem:[#allocation2 + $0x8] sm:$0xff] %vm163_vm2, %v595_v62  ;;  %v455_v2 = vadd.f32 %v445_v60, %v325_v0  ;;  %v304_v61 = vadd.f32 %v4252_v17, %v4249_v14  ;;  %v594_v13 = vadd.f32 %v4268_v47, %v448_v59 }
  0xee   :  { %v467_v4 = vld [vmem:[#allocation2 + $0x18] sm:$0xff]  ;;  %v719_v5 = vpop.f32.mrf.mxu0  ;;  %v589_v7 = vpop.f32.mrf.mxu1 }
  0xef   :  { %463 = vst.msk [vmem:[#allocation2 + $0x38] sm:$0x1f] %vm170_vm3, %v455_v2  ;;  %v597_v25 = vadd.f32 %v579_v57, %v467_v4  ;;  %v450_v12 = vadd.f32 %v4264_v41, %v304_v61  ;;  %v740_v14 = vadd.f32 %v4279_v1, %v594_v13 }
  0xf0   :  { %v4283_v8 = vpop.f32.mrf.mxu0  ;;  %v591_v9 = vpop.f32.mrf.mxu1 }
  0xf1   :  { %605 = vst.msk [vmem:[#allocation2 + $0x18] sm:$0xff] %vm163_vm2, %v597_v25 }
  0xf2   :  { %v469_v10 = vld [vmem:[#allocation2 + $0x28] sm:$0xff]  ;;  %v725_v31 = vpop.f32.mrf.mxu0 }
  0xf3   :  { %v599_v29 = vadd.f32 %v585_v3, %v469_v10  ;;  %v306_v10 = vadd.f32 %v4257_v23, %v4254_v18 }
  0xf4   :  { %v470_v11 = vld [vmem:[#allocation2 + $0x30] sm:$0x1f]  ;;  %v611_v36 = vld [vmem:[#allocation2 + $0x8] sm:$0xff]  ;;  %v4286_v15 = vpop.f32.mrf.mxu0  ;;  %v4289_v20 = vpop.f32.mrf.mxu1 }
  0xf5   :  { %607 = vst.msk [vmem:[#allocation2 + $0x28] sm:$0xff] %vm163_vm2, %v599_v29  ;;  %v600_v16 = vadd.f32 %v589_v7, %v470_v11  ;;  %v741_v19 = vadd.f32 %v719_v5, %v611_v36  ;;  %v452_v29 = vadd.f32 %v4270_v49, %v306_v10  ;;  %v596_v11 = vadd.f32 %v4274_v53, %v450_v12 }
  0xf6   :  { %v471_v21 = vld [vmem:[#allocation2 + $0x38] sm:$0x1f]  ;;  %v731_v22 = vpop.f32.mrf.mxu0  ;;  %v865_v26 = vpop.f32.mrf.mxu1  ;;  %v886_v23 = vadd.f32 %v4289_v20, %v740_v14 }
  0xf7   :  { %608 = vst [vmem:[#allocation2 + $0x30] sm:$0x1f] %v600_v16  ;;  %749 = vst.msk [vmem:[#allocation2 + $0x8] sm:$0xff] %vm163_vm2, %v741_v19  ;;  %v601_v24 = vadd.f32 %v591_v9, %v471_v21  ;;  %v742_v18 = vadd.f32 %v4283_v8, %v596_v11 }
  0xf8   :  { %v613_v27 = vld [vmem:[#allocation2 + $0x18] sm:$0xff]  ;;  %v735_v28 = vpop.f32.mrf.mxu0  ;;  %v4293_v32 = vpop.f32.mrf.mxu1 }
  0xf9   :  { %609 = vst.msk [vmem:[#allocation2 + $0x38] sm:$0x1f] %vm170_vm3, %v601_v24  ;;  %v743_v30 = vadd.f32 %v725_v31, %v613_v27 }
  0xfa   :  { %v737_v34 = vpop.f32.mrf.mxu0  ;;  %v871_v35 = vpop.f32.mrf.mxu1 }
  0xfb   :  { %751 = vst.msk [vmem:[#allocation2 + $0x18] sm:$0xff] %vm163_vm2, %v743_v30  ;;  %v888_v30 = vadd.f32 %v4293_v32, %v742_v18 }
  0xfc   :  { %v615_v37 = vld [vmem:[#allocation2 + $0x28] sm:$0xff]  ;;  %v4296_v39 = vpop.f32.mrf.mxu1 }
  0xfd   :  { %v745_v38 = vadd.f32 %v731_v22, %v615_v37  ;;  %v598_v22 = vadd.f32 %v4277_v63, %v452_v29 }
  0xfe   :  { %v616_v40 = vld [vmem:[#allocation2 + $0x30] sm:$0x1f]  ;;  %v757_v42 = vld [vmem:[#allocation2 + $0x8] sm:$0xff]  ;;  %v1009_v43 = vpop.f32.mrf.mxu0  ;;  %v877_v46 = vpop.f32.mrf.mxu1 }
  0xff   :  { %753 = vst.msk [vmem:[#allocation2 + $0x28] sm:$0xff] %vm163_vm2, %v745_v38  ;;  %v746_v44 = vadd.f32 %v735_v28, %v616_v40  ;;  %v887_v45 = vadd.f32 %v865_v26, %v757_v42  ;;  %v1032_v24 = vadd.f32 %v1009_v43, %v886_v23  ;;  %v744_v28 = vadd.f32 %v4286_v15, %v598_v22 }
 0x100   :  { %v617_v48 = vld [vmem:[#allocation2 + $0x38] sm:$0x1f]  ;;  %v1011_v50 = vpop.f32.mrf.mxu0  ;;  %v881_v52 = vpop.f32.mrf.mxu1 }
 0x101   :  { %754 = vst [vmem:[#allocation2 + $0x30] sm:$0x1f] %v746_v44  ;;  %895 = vst.msk [vmem:[#allocation2 + $0x8] sm:$0xff] %vm163_vm2, %v887_v45  ;;  %v747_v51 = vadd.f32 %v737_v34, %v617_v48  ;;  %v890_v15 = vadd.f32 %v4296_v39, %v744_v28 }
 0x102   :  { %v759_v55 = vld [vmem:[#allocation2 + $0x18] sm:$0xff]  ;;  %v1015_v56 = vpop.f32.mrf.mxu0  ;;  %v883_v58 = vpop.f32.mrf.mxu1 }
 0x103   :  { %755 = vst.msk [vmem:[#allocation2 + $0x38] sm:$0x1f] %vm170_vm3, %v747_v51  ;;  %v889_v57 = vadd.f32 %v871_v35, %v759_v55  ;;  %v1034_v40 = vadd.f32 %v1015_v56, %v888_v30 }
 0x104   :  { %v1017_v60 = vpop.f32.mrf.mxu0 }
 0x105   :  { %897 = vst.msk [vmem:[#allocation2 + $0x18] sm:$0xff] %vm163_vm2, %v889_v57 }
 0x106   :  { %v761_v62 = vld [vmem:[#allocation2 + $0x28] sm:$0xff]  ;;  %v1021_v0 = vpop.f32.mrf.mxu0  ;;  %v1155_v3 = vpop.f32.mrf.mxu1 }
 0x107   :  { %v891_v2 = vadd.f32 %v877_v46, %v761_v62  ;;  %v1178_v42 = vadd.f32 %v1155_v3, %v1032_v24  ;;  %v1036_v51 = vadd.f32 %v1021_v0, %v890_v15  ;;  %v1500_v15 = vld [vmem:[%s5008_s6 + $0x60] sm:$0xff] }
 0x108   :  { %v762_v4 = vld [vmem:[#allocation2 + $0x30] sm:$0x1f]  ;;  %v903_v5 = vld [vmem:[#allocation2 + $0x8] sm:$0xff]  ;;  %v1023_v25 = vpop.f32.mrf.mxu0  ;;  %v1157_v9 = vpop.f32.mrf.mxu1 }
 0x109   :  { %899 = vst.msk [vmem:[#allocation2 + $0x28] sm:$0xff] %vm163_vm2, %v891_v2  ;;  %v892_v33 = vadd.f32 %v881_v52, %v762_v4  ;;  %v1033_v7 = vadd.f32 %v1011_v50, %v903_v5 }
 0x10a   :  { %v763_v17 = vld [vmem:[#allocation2 + $0x38] sm:$0x1f]  ;;  %v1027_v31 = vpop.f32.mrf.mxu0  ;;  %v1161_v47 = vpop.f32.mrf.mxu1 }
 0x10b   :  { %900 = vst [vmem:[#allocation2 + $0x30] sm:$0x1f] %v892_v33  ;;  %1041 = vst.msk [vmem:[#allocation2 + $0x8] sm:$0xff] %vm163_vm2, %v1033_v7  ;;  %v893_v41 = vadd.f32 %v883_v58, %v763_v17  ;;  %v1180_v52 = vadd.f32 %v1161_v47, %v1034_v40 }
 0x10c   :  { %v905_v36 = vld [vmem:[#allocation2 + $0x18] sm:$0xff]  ;;  %v1029_v16 = vpop.f32.mrf.mxu0  ;;  %v1163_v21 = vpop.f32.mrf.mxu1 }
 0x10d   :  { %901 = vst.msk [vmem:[#allocation2 + $0x38] sm:$0x1f] %vm170_vm3, %v893_v41  ;;  %v1035_v19 = vadd.f32 %v1017_v60, %v905_v36 }
 0x10e   :  { %v1167_v1 = vpop.f32.mrf.mxu1 }
 0x10f   :  { %1043 = vst.msk [vmem:[#allocation2 + $0x18] sm:$0xff] %vm163_vm2, %v1035_v19  ;;  %v1182_v61 = vadd.f32 %v1167_v1, %v1036_v51  ;;  %v1495_v51 = vld [vmem:[%s5008_s6 + $0x38] sm:$0xff] }
 0x110   :  { %v907_v26 = vld [vmem:[#allocation2 + $0x28] sm:$0xff]  ;;  %v1301_v49 = vpop.f32.mrf.mxu0  ;;  %v1169_v53 = vpop.f32.mrf.mxu1 }
 0x111   :  { %v1037_v27 = vadd.f32 %v1023_v25, %v907_v26  ;;  %v1324_v46 = vadd.f32 %v1301_v49, %v1178_v42 }
 0x112   :  { %v908_v34 = vld [vmem:[#allocation2 + $0x30] sm:$0x1f]  ;;  %v1049_v35 = vld [vmem:[#allocation2 + $0x8] sm:$0xff]  ;;  %v1303_v37 = vpop.f32.mrf.mxu0  ;;  %v1173_v38 = vpop.f32.mrf.mxu1 }
 0x113   :  { %1045 = vst.msk [vmem:[#allocation2 + $0x28] sm:$0xff] %vm163_vm2, %v1037_v27  ;;  %v1038_v8 = vadd.f32 %v1027_v31, %v908_v34  ;;  %v1179_v20 = vadd.f32 %v1157_v9, %v1049_v35 }
 0x114   :  { %v909_v63 = vld [vmem:[#allocation2 + $0x38] sm:$0x1f]  ;;  %v1307_v43 = vpop.f32.mrf.mxu0  ;;  %v1175_v45 = vpop.f32.mrf.mxu1 }
 0x115   :  { %1046 = vst [vmem:[#allocation2 + $0x30] sm:$0x1f] %v1038_v8  ;;  %1187 = vst.msk [vmem:[#allocation2 + $0x8] sm:$0xff] %vm163_vm2, %v1179_v20  ;;  %v1039_v44 = vadd.f32 %v1029_v16, %v909_v63  ;;  %v1326_v56 = vadd.f32 %v1307_v43, %v1180_v52  ;;  %v1503_v43 = vld [vmem:[%s5008_s6 + $0x78] sm:$0xff]  ;;  %v1494_v52 = vld [vmem:[%s5008_s6 + $0x30] sm:$0xff] }
 0x116   :  { %v1051_v32 = vld [vmem:[#allocation2 + $0x18] sm:$0xff]  ;;  %v1309_v50 = vpop.f32.mrf.mxu0  ;;  %1738 = vmatpush1.msra.mxu1 %v1503_v43 }
 0x117   :  { %1047 = vst.msk [vmem:[#allocation2 + $0x38] sm:$0x1f] %vm170_vm3, %v1039_v44  ;;  %v1181_v48 = vadd.f32 %v1163_v21, %v1051_v32  ;;  %v1502_v44 = vld [vmem:[%s5008_s6 + $0x70] sm:$0xff]  ;;  %1739 = vmatprep.subr.mxu1 %v3654_v6  ;;  %v1499_v32 = vld [vmem:[%s5008_s6 + $0x58] sm:$0xff] }
 0x118   :  { %v1447_v54 = vpop.f32.mrf.mxu1  ;;  %v1313_v59 = vpop.f32.mrf.mxu0  ;;  %1740 = vmatpush1.msra.mxu1 %v1502_v44 }
 0x119   :  { %1189 = vst.msk [vmem:[#allocation2 + $0x18] sm:$0xff] %vm163_vm2, %v1181_v48  ;;  %v4328_v57 = vadd.f32 %v1447_v54, %v1324_v46  ;;  %v1328_v13 = vadd.f32 %v1313_v59, %v1182_v61  ;;  %1741 = vmatprep.subr.mxu1 %v3654_v6  ;;  %v1498_v46 = vld [vmem:[%s5008_s6 + $0x50] sm:$0xff]  ;;  %v1497_v48 = vld [vmem:[%s5008_s6 + $0x48] sm:$0xff] }
 0x11a   :  { %v1053_v55 = vld [vmem:[#allocation2 + $0x28] sm:$0xff]  ;;  %v1449_v60 = vpop.f32.mrf.mxu1  ;;  %v1315_v7 = vpop.f32.mrf.mxu0 }
 0x11b   :  { %v1183_v58 = vadd.f32 %v1169_v53, %v1053_v55  ;;  %1478 = vst [vmem:[#allocation2] sm:$0xff] %v4328_v57  ;;  %v1493_v54 = vld [vmem:[%s5008_s6 + $0x28] sm:$0xff]  ;;  %v1492_v55 = vld [vmem:[%s5008_s6 + $0x20] sm:$0xff] }
 0x11c   :  { %v1054_v39 = vld [vmem:[#allocation2 + $0x30] sm:$0x1f]  ;;  %v1195_v62 = vld [vmem:[#allocation2 + $0x8] sm:$0xff]  ;;  %v1453_v3 = vpop.f32.mrf.mxu1  ;;  %v1319_v31 = vpop.f32.mrf.mxu0 }
 0x11d   :  { %1191 = vst.msk [vmem:[#allocation2 + $0x28] sm:$0xff] %vm163_vm2, %v1183_v58  ;;  %v1184_v2 = vadd.f32 %v1173_v38, %v1054_v39  ;;  %v1325_v0 = vadd.f32 %v1303_v37, %v1195_v62  ;;  %v4332_v4 = vadd.f32 %v1453_v3, %v1326_v56  ;;  %v1491_v56 = vld [vmem:[%s5008_s6 + $0x18] sm:$0xff]  ;;  %v1490_v58 = vld [vmem:[%s5008_s6 + $0x10] sm:$0xff]  ;;  %v1489_v59 = vld [vmem:[%s5008_s6 + $0x8] sm:$0xff] }
 0x11e   :  { %v1055_v12 = vld [vmem:[#allocation2 + $0x38] sm:$0x1f]  ;;  %v1455_v25 = vpop.f32.mrf.mxu1  ;;  %v1321_v19 = vpop.f32.mrf.mxu0  ;;  %v1509_v61 = vld [vmem:[%s5008_s6 + $0xa8] sm:$0x1f]  ;;  %v1508_v39 = vld [vmem:[%s5008_s6 + $0xa0] sm:$0xff] }
 0x11f   :  { %1192 = vst [vmem:[#allocation2 + $0x30] sm:$0x1f] %v1184_v2  ;;  %1333 = vst.msk [vmem:[#allocation2 + $0x8] sm:$0xff] %vm163_vm2, %v1325_v0  ;;  %v1185_v5 = vadd.f32 %v1175_v45, %v1055_v12  ;;  %1530 = vrot.lane.b32.xlu0 %v4332_v4, %s3655_s0  ;;  %v1501_v45 = vld [vmem:[%s5008_s6 + $0x68] sm:$0xff]  ;;  %v1507_v62 = vld [vmem:[%s5008_s6 + $0x98] sm:$0xff] }
 0x120   :  { %v1197_v33 = vld [vmem:[#allocation2 + $0x18] sm:$0xff]  ;;  %v1459_v10 = vpop.f32.mrf.mxu1  ;;  %1742 = vmatpush1.msra.mxu1 %v1501_v45  ;;  %v1506_v2 = vld [vmem:[%s5008_s6 + $0x90] sm:$0xff] }
 0x121   :  { %1193 = vst.msk [vmem:[#allocation2 + $0x38] sm:$0x1f] %vm170_vm3, %v1185_v5  ;;  %v1327_v9 = vadd.f32 %v1309_v50, %v1197_v33  ;;  %v4338_v14 = vadd.f32 %v1459_v10, %v1328_v13  ;;  %1743 = vmatprep.subr.mxu1 %v3654_v6  ;;  %v1496_v50 = vld [vmem:[%s5008_s6 + $0x40] sm:$0xff] }
 0x122   :  { %v1461_v23 = vpop.f32.mrf.mxu1  ;;  %v4377_v42 = vld [vmem:[#allocation2] sm:$0xfe]  ;;  %1744 = vmatpush1.msra.mxu1 %v1500_v15 }
 0x123   :  { %1335 = vst.msk [vmem:[#allocation2 + $0x18] sm:$0xff] %vm163_vm2, %v1327_v9  ;;  %1745 = vmatprep.subr.mxu1 %v3654_v6 }
 0x124   :  { %v1199_v17 = vld [vmem:[#allocation2 + $0x28] sm:$0xff]  ;;  %v1465_v24 = vpop.f32.mrf.mxu1  ;;  %1746 = vmatpush1.msra.mxu1 %v1499_v32 }
 0x125   :  { %v1329_v41 = vadd.f32 %v1315_v7, %v1199_v17  ;;  %1747 = vmatprep.subr.mxu1 %v3654_v6 }
 0x126   :  { %v1200_v47 = vld [vmem:[#allocation2 + $0x30] sm:$0x1f]  ;;  %v1341_v29 = vld [vmem:[#allocation2 + $0x8] sm:$0xff]  ;;  %v1467_v28 = vpop.f32.mrf.mxu1  ;;  %1748 = vmatpush1.msra.mxu1 %v1498_v46 }
 0x127   :  { %1337 = vst.msk [vmem:[#allocation2 + $0x28] sm:$0xff] %vm163_vm2, %v1329_v41  ;;  %v1330_v11 = vadd.f32 %v1319_v31, %v1200_v47  ;;  %v1471_v36 = vadd.f32 %v1449_v60, %v1341_v29  ;;  %1749 = vmatprep.subr.mxu1 %v3654_v6  ;;  %v1488_v60 = vld [vmem:[%s5008_s6] sm:$0xff] }
 0x128   :  { %v1201_v16 = vld [vmem:[#allocation2 + $0x38] sm:$0x1f]  ;;  %1750 = vmatpush1.msra.mxu1 %v1497_v48 }
 0x129   :  { %1338 = vst [vmem:[#allocation2 + $0x30] sm:$0x1f] %v1330_v11  ;;  %1479 = vst.msk [vmem:[#allocation2 + $0x8] sm:$0xff] %vm163_vm2, %v1471_v36  ;;  %v1331_v21 = vadd.f32 %v1321_v19, %v1201_v16  ;;  %1751 = vmatprep.subr.mxu1 %v3654_v6 }
 0x12a   :  { %v1343_v18 = vld [vmem:[#allocation2 + $0x18] sm:$0xff]  ;;  %1752 = vmatpush1.msra.mxu1 %v1496_v50 }
 0x12b   :  { %1339 = vst.msk [vmem:[#allocation2 + $0x38] sm:$0x1f] %vm170_vm3, %v1331_v21  ;;  %v1473_v1 = vadd.f32 %v1455_v25, %v1343_v18  ;;  %1753 = vmatprep.subr.mxu1 %v3654_v6 }
 0x12c   :  { %1754 = vmatpush1.msra.mxu1 %v1495_v51 }
 0x12d   :  { %1481 = vst.msk [vmem:[#allocation2 + $0x18] sm:$0xff] %vm163_vm2, %v1473_v1  ;;  %1755 = vmatprep.subr.mxu1 %v3654_v6 }
 0x12e   :  { %v1345_v22 = vld [vmem:[#allocation2 + $0x28] sm:$0xff]  ;;  %1756 = vmatpush1.msra.mxu1 %v1494_v52 }
 0x12f   :  { %v1475_v26 = vadd.f32 %v1461_v23, %v1345_v22  ;;  %1757 = vmatprep.subr.mxu1 %v3654_v6 }
 0x130   :  { %v1346_v49 = vld [vmem:[#allocation2 + $0x30] sm:$0x1f]  ;;  %v4373_v40 = vld [vmem:[#allocation2 + $0x8] sm:$0xfe]  ;;  %1758 = vmatpush1.msra.mxu1 %v1493_v54  ;;  %v1486_v54 = vld [vmem:[%s5007_s5] sm:$0xff] }
 0x131   :  { %1483 = vst.msk [vmem:[#allocation2 + $0x28] sm:$0xff] %vm163_vm2, %v1475_v26  ;;  %v1476_v27 = vadd.f32 %v1465_v24, %v1346_v49  ;;  %v4381_v63 = vld [vmem:[#allocation2 + $0x8] sm:$0xff]  ;;  %1759 = vmatprep.subr.mxu1 %v3654_v6 }
 0x132   :  { %v1347_v53 = vld [vmem:[#allocation2 + $0x38] sm:$0x1f]  ;;  %1760 = vmatpush1.msra.mxu1 %v1492_v55  ;;  %v1505_v55 = vld [vmem:[%s5008_s6 + $0x88] sm:$0xff] }
 0x133   :  { %1484 = vst [vmem:[#allocation2 + $0x30] sm:$0x1f] %v1476_v27  ;;  %v1477_v30 = vadd.f32 %v1467_v28, %v1347_v53  ;;  %1761 = vmatprep.subr.mxu1 %v3654_v6 }
 0x134   :  { %v4346_v34 = vld [vmem:[#allocation2 + $0x18] sm:$0xff]  ;;  %1762 = vmatpush1.msra.mxu1 %v1491_v56  ;;  %v1504_v56 = vld [vmem:[%s5008_s6 + $0x80] sm:$0xff] }
 0x135   :  { %1485 = vst.msk [vmem:[#allocation2 + $0x38] sm:$0x1f] %vm170_vm3, %v1477_v30  ;;  %1532 = vrot.lane.b32.xlu1 %v4346_v34, %s3655_s0  ;;  %1763 = vmatprep.subr.mxu1 %v3654_v6 }
 0x136   :  { %1764 = vmatpush1.msra.mxu1 %v1490_v58  ;;  %v1822_v58 = vld [vmem:[%s5009_s7 + $0x50] sm:$0xf] }
 0x137   :  { %1765 = vmatprep.subr.mxu1 %v3654_v6 }
 0x138   :  { %v4357_v37 = vld [vmem:[#allocation2 + $0x28] sm:$0xff]  ;;  %1766 = vmatpush1.msra.mxu1 %v1489_v59 }
 0x139   :  { %1534 = vrot.lane.b32.xlu1 %v4338_v14, %s3655_s0  ;;  %1767 = vmatprep.subr.mxu1 %v3654_v6  ;;  %v1821_v59 = vld [vmem:[%s5009_s7 + $0x48] sm:$0xff] }
 0x13a   :  { %v4353_v35 = vld [vmem:[#allocation2 + $0x30] sm:$0x1f]  ;;  %1768 = vmatpush1.msra.mxu1 %v1488_v60  ;;  %v3160_v60 = vld [vmem:[%s5009_s7 + $0x100] sm:$0xf] }
 0x13b   :  { %1575 = vrot.lane.b32.xlu0 %v4353_v35, %s3655_s0  ;;  %v4361_v8 = vld [vmem:[#allocation2 + $0x30] sm:$0xf]  ;;  %1789 = vmatprep.subr.mxu1 %v3654_v6 }
 0x13c   :  { %v4365_v20 = vld [vmem:[#allocation2 + $0x38] sm:$0xf]  ;;  %3130 = vmatpush2.msk.msra.mxu1 %vm1733_vm4, %v1509_v61  ;;  %v1820_v61 = vld [vmem:[%s5009_s7 + $0x40] sm:$0xff] }
 0x13d   :  { %1536 = vrot.lane.b32.xlu1 %v4357_v37, %s3655_s0  ;;  %v4369_v38 = vld [vmem:[#allocation2 + $0x38] sm:$0x1f]  ;;  %1791 = vmatprep.subr.mxu1 %v3654_v6 }
 0x13e   :  { %1792 = vmatpush2.msra.mxu1 %v1508_v39  ;;  %v1819_v39 = vld [vmem:[%s5009_s7 + $0x38] sm:$0xff] }
 0x13f   :  { %1538 = vrot.lane.b32.xlu0 %v4361_v8, %s3655_s0  ;;  %1793 = vmatprep.subr.mxu1 %v3654_v6 }
 0x140   :  { %1794 = vmatpush2.msra.mxu1 %v1507_v62  ;;  %v1818_v62 = vld [vmem:[%s5009_s7 + $0x30] sm:$0xff] }
 0x141   :  { %1540 = vrot.lane.b32.xlu1 %v4365_v20, %s3655_s0  ;;  %1795 = vmatprep.subr.mxu1 %v3654_v6 }
 0x142   :  { %1796 = vmatpush2.msra.mxu1 %v1506_v2  ;;  %v1817_v2 = vld [vmem:[%s5009_s7 + $0x28] sm:$0xff] }
 0x143   :  { %1577 = vrot.lane.b32.xlu0 %v4369_v38, %s3655_s0  ;;  %1797 = vmatprep.subr.mxu1 %v3654_v6 }
 0x144   :  { %1798 = vmatpush2.msra.mxu1 %v1505_v55  ;;  %v3180_v55 = vld [vmem:[%s5009_s7 + $0x170] sm:$0xff] }
 0x145   :  { %1573 = vrot.lane.b32.xlu1 %v4373_v40, %s3655_s0  ;;  %1799 = vmatprep.subr.mxu1 %v3654_v6 }
 0x146   :  { %1800 = vmatpush2.msra.mxu1 %v1504_v56  ;;  %v3174_v56 = vld [vmem:[%s5009_s7 + $0x158] sm:$0xf] }
 0x147   :  { %1571 = vrot.lane.b32.xlu0 %v4377_v42, %s3655_s0  ;;  %3418 = vmatprep.subr.msk.mxu1 %vm1635_vm7, %v3160_v60 }
 0x149   :  { %1528 = vrot.lane.b32.xlu1 %v4381_v63, %s3655_s0 }
 0x14b   :  { %1526 = vrot.lane.b32.xlu0 %v4328_v57, %s3655_s0 }
 0x191   :  { %v1531_v3 = vpop.permute.xlu0 %1530 }
 0x1a7   :  { %v1533_v0 = vpop.permute.xlu1 %1532 }
 0x1a8   :  { %v1544_v9 = vsel %vm1542_vm5, %v1531_v3, %v1533_v0  ;;  %v1558_v10 = vmax.f32 %v4346_v34, %v1533_v0  ;;  %v1816_v0 = vld [vmem:[%s5009_s7 + $0x20] sm:$0xff]  ;;  %v1815_v3 = vld [vmem:[%s5009_s7 + $0x18] sm:$0xff] }
 0x1a9   :  { %v1557_v41 = vmax.f32 %v4332_v4, %v1544_v9  ;;  %v3157_v9 = vld [vmem:[%s5009_s7 + $0xe8] sm:$0xff] }
 0x1aa   :  { %v1602_v19 = vrot.slane %v1558_v10, 1 }
 0x1ab   :  { %v1535_v12 = vpop.permute.xlu1 %1534  ;;  %v1599_v22 = vrot.slane %v1557_v41, 1 }
 0x1ad   :  { %v1576_v13 = vpop.permute.xlu0 %1575 }
 0x1af   :  { %v1537_v5 = vpop.permute.xlu1 %1536 }
 0x1b0   :  { %v1545_v25 = vsel %vm1542_vm5, %v1535_v12, %v1537_v5  ;;  %v1560_v33 = vmax.f32 %v4357_v37, %v1537_v5  ;;  %v3159_v5 = vld [vmem:[%s5009_s7 + $0xf8] sm:$0xff] }
 0x1b1   :  { %v1539_v7 = vpop.permute.xlu0 %1538  ;;  %v1559_v31 = vmax.f32 %v4338_v14, %v1545_v25 }
 0x1b2   :  { %v1606_v47 = vrot.slane %v1560_v33, 1 }
 0x1b3   :  { %v1541_v17 = vpop.permute.xlu1 %1540  ;;  %v1604_v23 = vrot.slane %v1559_v31, 1 }
 0x1b4   :  { %v1546_v11 = vsel %vm1542_vm5, %v1539_v7, %v1541_v17  ;;  %v1562_v1 = vmax.f32 %v4365_v20, %v1541_v17  ;;  %v1607_v27 = vsel %vm1597_vm6, %v1602_v19, %v1606_v47  ;;  %v3155_v17 = vld [vmem:[%s5009_s7 + $0xd8] sm:$0xff] }
 0x1b5   :  { %v1578_v29 = vpop.permute.xlu0 %1577  ;;  %v1561_v24 = vmax.f32 %v4361_v8, %v1546_v11  ;;  %v1605_v44 = vsel %vm1597_vm6, %v1599_v22, %v1604_v23  ;;  %v1623_v48 = vmax.f32 %v1558_v10, %v1607_v27  ;;  %v3156_v10 = vld [vmem:[%s5009_s7 + $0xe0] sm:$0xff] }
 0x1b6   :  { %v1580_v36 = vsel %vm1542_vm5, %v1576_v13, %v1578_v29  ;;  %v1588_v16 = vmax.f32 %v4369_v38, %v1578_v29  ;;  %v3153_v29 = vld [vmem:[%s5009_s7 + $0xc8] sm:$0xff]  ;;  %v1812_v11 = vld [vmem:[%s5009_s7] sm:$0xff] }
 0x1b7   :  { %v1587_v21 = vmax.f32 %v4353_v35, %v1580_v36  ;;  %v1574_v18 = vpop.permute.xlu1 %1573  ;;  %v3152_v36 = vld [vmem:[%s5009_s7 + $0xc0] sm:$0xff] }
 0x1b8   :  { %v1610_v14 = vrot.slane %v1588_v16, 1  ;;  %v1586_v4 = vmax.f32 %v4373_v40, %v1574_v18  ;;  %v3146_v16 = vld [vmem:[%s5009_s7 + $0xa8] sm:$0xf] }
 0x1b9   :  { %v1608_v26 = vrot.slane %v1587_v21, 1  ;;  %v1572_v49 = vpop.permute.xlu0 %1571  ;;  %v3150_v21 = vld [vmem:[%s5009_s7 + $0xb0] sm:$0xff] }
 0x1ba   :  { %v1627_v53 = vmax.f32 %v1562_v1, %v1610_v14  ;;  %v1601_v28 = vrot.slane %v1586_v4, 1  ;;  %v1579_v30 = vsel %vm1542_vm5, %v1572_v49, %v1574_v18  ;;  %v1611_v34 = vsel %vm1597_vm6, %v1606_v47, %v1610_v14  ;;  %v1813_v47 = vld [vmem:[%s5009_s7 + $0x8] sm:$0xff]  ;;  %v3188_v18 = vld [vmem:[%s5009_s7 + $0x1b0] sm:$0xf] }
 0x1bb   :  { %v1609_v35 = vsel %vm1597_vm6, %v1604_v23, %v1608_v26  ;;  %v1626_v37 = vmax.f32 %v1561_v24, %v1608_v26  ;;  %v1585_v20 = vmax.f32 %v4377_v42, %v1579_v30  ;;  %v1529_v38 = vpop.permute.xlu1 %1528  ;;  %v1625_v40 = vmax.f32 %v1560_v33, %v1611_v34  ;;  %v3158_v33 = vld [vmem:[%s5009_s7 + $0xf0] sm:$0xff]  ;;  %v3129_v23 = vld [vmem:[%s5003_s1] ss:$0 sm:$0xff]  ;;  %v3144_v34 = vld [vmem:[%s5009_s7 + $0x98] sm:$0xff] }
 0x1bc   :  { %v1556_v43 = vmax.f32 %v4381_v63, %v1529_v38  ;;  %3125 = vmatprep.subr.msk.mxu0 %vm1635_vm7, %v1627_v53  ;;  %v1624_v8 = vmax.f32 %v1559_v31, %v1609_v35  ;;  %v1603_v15 = vsel %vm1597_vm6, %v1601_v28, %v1602_v19  ;;  %v1622_v63 = vmax.f32 %v1557_v41, %v1605_v44  ;;  %v1814_v31 = vld [vmem:[%s5009_s7 + $0x10] sm:$0xff]  ;;  %v3151_v19 = vld [vmem:[%s5009_s7 + $0xb8] sm:$0xff]  ;;  %v3145_v26 = vld [vmem:[%s5009_s7 + $0xa0] sm:$0xff] }
 0x1bd   :  { %v1598_v45 = vrot.slane %v1585_v20, 1  ;;  %v1527_v32 = vpop.permute.xlu0 %1526  ;;  %3126 = vmatpush1.msk.msra.mxu0 %vm1635_vm7, %v1626_v37  ;;  %v3154_v41 = vld [vmem:[%s5009_s7 + $0xd0] sm:$0xff]  ;;  %v3142_v44 = vld [vmem:[%s5009_s7 + $0x88] sm:$0xff] }
 0x1be   :  { %v1543_v46 = vsel %vm1542_vm5, %v1527_v32, %v1529_v38  ;;  %1668 = vmatprep.subr.mxu0 %v1625_v40  ;;  %v1621_v51 = vmax.f32 %v1556_v43, %v1603_v15  ;;  %v3143_v38 = vld [vmem:[%s5009_s7 + $0x90] sm:$0xff]  ;;  %v3187_v40 = vld [vmem:[%s5009_s7 + $0x1a8] sm:$0xff]  ;;  %v3141_v15 = vld [vmem:[%s5009_s7 + $0x80] sm:$0xff] }
 0x1bf   :  { %v1555_v42 = vmax.f32 %v4328_v57, %v1543_v46  ;;  %v1600_v50 = vsel %vm1597_vm6, %v1598_v45, %v1599_v22  ;;  %1669 = vmatpush1.msra.mxu0 %v1624_v8  ;;  %v1487_v57 = vld [vmem:[%s5007_s5 + $0x8] sm:$0x3f]  ;;  %v3186_v45 = vld [vmem:[%s5009_s7 + $0x1a0] sm:$0xff]  ;;  %v3185_v32 = vld [vmem:[%s5009_s7 + $0x198] sm:$0xff] }
 0x1c0   :  { %1670 = vmatprep.subr.mxu0 %v1623_v48  ;;  %v3140_v46 = vld [vmem:[%s5009_s7 + $0x78] sm:$0xff]  ;;  %v3184_v48 = vld [vmem:[%s5009_s7 + $0x190] sm:$0xff] }
 0x1c1   :  { %v1620_v52 = vmax.f32 %v1555_v42, %v1600_v50  ;;  %1671 = vmatpush1.msra.mxu0 %v1622_v63  ;;  %v3139_v42 = vld [vmem:[%s5009_s7 + $0x70] sm:$0xff]  ;;  %v3183_v50 = vld [vmem:[%s5009_s7 + $0x188] sm:$0xff] }
 0x1c2   :  { %1672 = vmatprep.subr.mxu0 %v1621_v51  ;;  %v3138_v63 = vld [vmem:[%s5009_s7 + $0x68] sm:$0xff]  ;;  %v3182_v51 = vld [vmem:[%s5009_s7 + $0x180] sm:$0xff] }
 0x1c3   :  { %1673 = vmatpush1.msra.mxu0 %v1620_v52  ;;  %v3137_v52 = vld [vmem:[%s5009_s7 + $0x60] sm:$0xff] }
 0x1c4   :  { %3127 = vmatmul.mubr.msk.f32.vlgmr.msra.gmra.mxu0 %vm1628_vm8, %v1486_v54  ;;  %3368 = vmatprep.subr.msk.mxu0 %vm1635_vm7, %v1822_v58  ;;  %v3181_v54 = vld [vmem:[%s5009_s7 + $0x178] sm:$0xff] }
 0x1c5   :  { %1712 = vmatprep.mubr.f32.mxu0 %v3654_v6  ;;  %3369 = vmatpush3.msk.msra.mxu0 %vm1635_vm7, %v1822_v58 }
 0x1c6   :  { %3370 = vmatprep.subr.mxu0 %v1821_v59 }
 0x1c7   :  { %3371 = vmatpush3.msra.mxu0 %v1821_v59  ;;  %v3179_v59 = vld [vmem:[%s5009_s7 + $0x168] sm:$0xff] }
 0x1c8   :  { %3128 = vmatmul.mubr.msk.f32.gmra.mxu0 %vm1628_vm8, %v1487_v57  ;;  %3372 = vmatprep.subr.mxu0 %v1820_v61  ;;  %v3136_v57 = vld [vmem:[%s5009_s7 + $0x58] sm:$0xff] }
 0x1c9   :  { %3373 = vmatpush3.msra.mxu0 %v1820_v61  ;;  %v3173_v61 = vld [vmem:[%s5009_s7 + $0x150] sm:$0xff] }
 0x1ca   :  { %3374 = vmatprep.subr.mxu0 %v1819_v39 }
 0x1cb   :  { %3375 = vmatpush3.msra.mxu0 %v1819_v39  ;;  %v3178_v39 = vld [vmem:[%s5009_s7 + $0x160] sm:$0xff] }
 0x1cc   :  { %3376 = vmatprep.subr.mxu0 %v1818_v62 }
 0x1cd   :  { %3377 = vmatpush3.msra.mxu0 %v1818_v62 }
 0x1ce   :  { %3378 = vmatprep.subr.mxu0 %v1817_v2 }
 0x1cf   :  { %3379 = vmatpush3.msra.mxu0 %v1817_v2  ;;  %v3172_v2 = vld [vmem:[%s5009_s7 + $0x148] sm:$0xff] }
 0x1d0   :  { %3380 = vmatprep.subr.mxu0 %v1816_v0 }
 0x1d1   :  { %3381 = vmatpush3.msra.mxu0 %v1816_v0  ;;  %v3171_v0 = vld [vmem:[%s5009_s7 + $0x140] sm:$0xff] }
 0x1d2   :  { %3382 = vmatprep.subr.mxu0 %v1815_v3 }
 0x1d3   :  { %3383 = vmatpush3.msra.mxu0 %v1815_v3  ;;  %v3170_v3 = vld [vmem:[%s5009_s7 + $0x138] sm:$0xff] }
 0x1d4   :  { %3384 = vmatprep.subr.mxu0 %v1814_v31 }
 0x1d5   :  { %3385 = vmatpush3.msra.mxu0 %v1814_v31 }
 0x1d6   :  { %3386 = vmatprep.subr.mxu0 %v1813_v47 }
 0x1d7   :  { %3387 = vmatpush3.msra.mxu0 %v1813_v47 }
 0x1d8   :  { %3388 = vmatprep.subr.mxu0 %v1812_v11 }
 0x1d9   :  { %3389 = vmatpush3.msra.mxu0 %v1812_v11 }
 0x1da   :  { %3393 = vmatprep.subr.msk.mxu0 %vm1635_vm7, %v3146_v16 }
 0x284   :  { %v1708_v12 = vpop.f32.mrf.mxu0 }
 0x286   :  { %v1710_v13 = vpop.f32.mrf.mxu0 }
 0x287   :  { %3131 = vmatprep.mubr.msk.f32.mxu1 %vm1726_vm9, %v1710_v13  ;;  %v3168_v13 = vld [vmem:[%s5009_s7 + $0x128] sm:$0xff] }
 0x288   :  { %v1714_v25 = vpop.f32.mrf.mxu0  ;;  %1802 = vmatmul.mubr.f32.vlgmr.msra.gmra.mxu1 %v1708_v12  ;;  %v3169_v12 = vld [vmem:[%s5009_s7 + $0x130] sm:$0xff] }
 0x289   :  { %3419 = vmatpush3.msk.msra.mxu1 %vm1635_vm7, %v3160_v60 }
 0x28a   :  { %v1716_v7 = vpop.f32.mrf.mxu0  ;;  %3420 = vmatprep.subr.mxu1 %v3159_v5 }
 0x28b   :  { %3132 = vmatprep.mubr.msk.f32.mxu1 %vm1726_vm9, %v1716_v7  ;;  %3421 = vmatpush3.msra.mxu1 %v3159_v5  ;;  %v3167_v5 = vld [vmem:[%s5009_s7 + $0x120] sm:$0xff]  ;;  %v3164_v7 = vld [vmem:[%s5009_s7 + $0x108] sm:$0xff] }
 0x28c   :  { %1807 = vmatmul.mubr.f32.gmra.mxu1 %v1714_v25  ;;  %3422 = vmatprep.subr.mxu1 %v3158_v33  ;;  %v3166_v25 = vld [vmem:[%s5009_s7 + $0x118] sm:$0xff] }
 0x28d   :  { %3423 = vmatpush3.msra.mxu1 %v3158_v33  ;;  %v3165_v33 = vld [vmem:[%s5009_s7 + $0x110] sm:$0xff] }
 0x28e   :  { %3424 = vmatprep.subr.mxu1 %v3157_v9 }
 0x28f   :  { %3425 = vmatpush3.msra.mxu1 %v3157_v9 }
 0x290   :  { %3426 = vmatprep.subr.mxu1 %v3156_v10 }
 0x291   :  { %3427 = vmatpush3.msra.mxu1 %v3156_v10 }
 0x292   :  { %3428 = vmatprep.subr.mxu1 %v3155_v17 }
 0x293   :  { %3429 = vmatpush3.msra.mxu1 %v3155_v17 }
 0x294   :  { %3430 = vmatprep.subr.mxu1 %v3154_v41 }
 0x295   :  { %3431 = vmatpush3.msra.mxu1 %v3154_v41 }
 0x296   :  { %3432 = vmatprep.subr.mxu1 %v3153_v29 }
 0x297   :  { %3433 = vmatpush3.msra.mxu1 %v3153_v29 }
 0x298   :  { %3434 = vmatprep.subr.mxu1 %v3152_v36 }
 0x299   :  { %3435 = vmatpush3.msra.mxu1 %v3152_v36 }
 0x29a   :  { %3436 = vmatprep.subr.mxu1 %v3151_v19 }
 0x29b   :  { %3437 = vmatpush3.msra.mxu1 %v3151_v19 }
 0x29c   :  { %3438 = vmatprep.subr.mxu1 %v3150_v21 }
 0x29d   :  { %3439 = vmatpush3.msra.mxu1 %v3150_v21 }
 0x29e   :  { %3468 = vmatprep.subr.msk.mxu1 %vm1635_vm7, %v3188_v18 }
 0x348   :  { %v1803_v1 = vpop.f32.mrf.mxu1 }
 0x349   :  { %v4589_v14 = vadd.f32 %v3129_v23, %v1803_v1 }
 0x34a   :  { %v1805_v4 = vpop.f32.mrf.mxu1 }
 0x34b   :  { %3390 = vmatprep.mubr.msk.f32.mxu0 %vm1823_vm10, %v4589_v14  ;;  %v2029_v27 = vrot.slane %v4589_v14, 2  ;;  %v1926_v28 = vrot.slane %v4589_v14, 1  ;;  %v2235_v43 = vrot.slane %v4589_v14, 4  ;;  %v2132_v60 = vrot.slane %v4589_v14, 3 }
 0x34c   :  { %v1808_v22 = vpop.f32.mrf.mxu1 }
 0x34d   :  { %v4593_v24 = vadd.f32 %v3129_v23, %v1808_v22 }
 0x34e   :  { %v1810_v49 = vpop.f32.mrf.mxu1 }
 0x34f   :  { %3391 = vmatmul.mubr.msk.f32.vlgmr.msra.gmra.mxu0 %vm1823_vm10, %v4593_v24  ;;  %v2030_v53 = vrot.slane %v4593_v24, 2  ;;  %v1927_v30 = vrot.slane %v4593_v24, 1  ;;  %v2236_v20 = vrot.slane %v4593_v24, 4  ;;  %v2133_v58 = vrot.slane %v4593_v24, 3 }
 0x350   :  { %3394 = vmatpush3.msk.msra.mxu0 %vm1635_vm7, %v3146_v16 }
 0x351   :  { %3395 = vmatprep.subr.mxu0 %v3145_v26  ;;  %v2031_v35 = vsel %vm66_vm0, %v2029_v27, %v2030_v53  ;;  %v1928_v37 = vsel %vm1597_vm6, %v1926_v28, %v1927_v30  ;;  %v2237_v8 = vsel %vm1635_vm7, %v2235_v43, %v2236_v20  ;;  %v2134_v62 = vsel %vm1733_vm4, %v2132_v60, %v2133_v58  ;;  %v2336_v43 = vld [vmem:[%s5011_s9 + $0x58] sm:$0xff] }
 0x352   :  { %3396 = vmatpush3.msra.mxu0 %v3145_v26  ;;  %3440 = vmatprep.mubr.msk.f32.mxu1 %vm1823_vm10, %v2031_v35  ;;  %v2339_v35 = vld [vmem:[%s5011_s9 + $0x70] sm:$0x7f]  ;;  %vm2451_vm0 = vcmask 973824  }
 0x353   :  { %3397 = vmatprep.subr.mxu0 %v3144_v34  ;;  %3415 = vmatprep.mubr.msk.f32.mxu0 %vm1823_vm10, %v1928_v37  ;;  %v2338_v37 = vld [vmem:[%s5011_s9 + $0x68] sm:$0xff] }
 0x354   :  { %3398 = vmatpush3.msra.mxu0 %v3144_v34  ;;  %3441 = vmatmul.mubr.msk.f32.vlgmr.msra.gmra.mxu1 %vm1823_vm10, %v2030_v53 }
 0x355   :  { %3469 = vmatpush3.msk.msra.mxu1 %vm1635_vm7, %v3188_v18  ;;  %3399 = vmatprep.subr.mxu0 %v3143_v38 }
 0x356   :  { %3470 = vmatprep.subr.mxu1 %v3187_v40  ;;  %3490 = vmatprep.mubr.msk.f32.mxu1 %vm1823_vm10, %v2237_v8 }
 0x357   :  { %3400 = vmatpush3.msra.mxu0 %v3143_v38  ;;  %3471 = vmatpush3.msra.mxu1 %v3187_v40  ;;  %v2337_v40 = vld [vmem:[%s5011_s9 + $0x60] sm:$0xff] }
 0x358   :  { %3401 = vmatprep.subr.mxu0 %v3142_v44  ;;  %3472 = vmatprep.subr.mxu1 %v3186_v45 }
 0x359   :  { %3402 = vmatpush3.msra.mxu0 %v3142_v44  ;;  %3473 = vmatpush3.msra.mxu1 %v3186_v45  ;;  %v2335_v45 = vld [vmem:[%s5011_s9 + $0x50] sm:$0xff] }
 0x35a   :  { %3403 = vmatprep.subr.mxu0 %v3141_v15  ;;  %3474 = vmatprep.subr.mxu1 %v3185_v32 }
 0x35b   :  { %3404 = vmatpush3.msra.mxu0 %v3141_v15  ;;  %3475 = vmatpush3.msra.mxu1 %v3185_v32  ;;  %v2334_v15 = vld [vmem:[%s5011_s9 + $0x48] sm:$0xff]  ;;  %v2333_v32 = vld [vmem:[%s5011_s9 + $0x40] sm:$0xff] }
 0x35c   :  { %3405 = vmatprep.subr.mxu0 %v3140_v46  ;;  %3476 = vmatprep.subr.mxu1 %v3184_v48 }
 0x35d   :  { %3406 = vmatpush3.msra.mxu0 %v3140_v46  ;;  %3477 = vmatpush3.msra.mxu1 %v3184_v48  ;;  %v2332_v46 = vld [vmem:[%s5011_s9 + $0x38] sm:$0xff]  ;;  %v2331_v48 = vld [vmem:[%s5011_s9 + $0x30] sm:$0xff] }
 0x35e   :  { %3407 = vmatprep.subr.mxu0 %v3139_v42  ;;  %3478 = vmatprep.subr.mxu1 %v3183_v50 }
 0x35f   :  { %3408 = vmatpush3.msra.mxu0 %v3139_v42  ;;  %3479 = vmatpush3.msra.mxu1 %v3183_v50  ;;  %v2330_v42 = vld [vmem:[%s5011_s9 + $0x28] sm:$0xff]  ;;  %v2329_v50 = vld [vmem:[%s5011_s9 + $0x20] sm:$0xff] }
 0x360   :  { %3409 = vmatprep.subr.mxu0 %v3138_v63  ;;  %3480 = vmatprep.subr.mxu1 %v3182_v51 }
 0x361   :  { %3410 = vmatpush3.msra.mxu0 %v3138_v63  ;;  %3481 = vmatpush3.msra.mxu1 %v3182_v51  ;;  %v2328_v63 = vld [vmem:[%s5011_s9 + $0x18] sm:$0xff]  ;;  %v2327_v51 = vld [vmem:[%s5011_s9 + $0x10] sm:$0xff] }
 0x362   :  { %3411 = vmatprep.subr.mxu0 %v3137_v52  ;;  %3482 = vmatprep.subr.mxu1 %v3181_v54 }
 0x363   :  { %3412 = vmatpush3.msra.mxu0 %v3137_v52  ;;  %3483 = vmatpush3.msra.mxu1 %v3181_v54  ;;  %v2326_v52 = vld [vmem:[%s5011_s9 + $0x8] sm:$0xff] }
 0x364   :  { %3413 = vmatprep.subr.mxu0 %v3136_v57  ;;  %3484 = vmatprep.subr.mxu1 %v3180_v55 }
 0x365   :  { %3414 = vmatpush3.msra.mxu0 %v3136_v57  ;;  %3485 = vmatpush3.msra.mxu1 %v3180_v55 }
 0x366   :  { %3416 = vmatmul.mubr.msk.f32.vlgmr.msra.gmra.mxu0 %vm1823_vm10, %v1927_v30  ;;  %3443 = vmatprep.subr.msk.mxu0 %vm1635_vm7, %v3174_v56 }
 0x367   :  { %3486 = vmatprep.subr.mxu1 %v3179_v59  ;;  %3444 = vmatpush3.msk.msra.mxu0 %vm1635_vm7, %v3174_v56 }
 0x368   :  { %3465 = vmatprep.mubr.msk.f32.mxu0 %vm1823_vm10, %v2134_v62  ;;  %3487 = vmatpush3.msra.mxu1 %v3179_v59 }
 0x369   :  { %3445 = vmatprep.subr.mxu0 %v3173_v61  ;;  %3488 = vmatprep.subr.mxu1 %v3178_v39 }
 0x36a   :  { %3446 = vmatpush3.msra.mxu0 %v3173_v61  ;;  %3489 = vmatpush3.msra.mxu1 %v3178_v39 }
 0x36b   :  { %3447 = vmatprep.subr.mxu0 %v3172_v2  ;;  %3491 = vmatmul.mubr.msk.f32.vlgmr.msra.gmra.mxu1 %vm1823_vm10, %v2236_v20 }
 0x36c   :  { %3448 = vmatpush3.msra.mxu0 %v3172_v2  ;;  %3493 = vmatprep.subr.mxu1 %v3654_v6  ;;  %v2324_v2 = vld [vmem:[%s5010_s8] sm:$0x1f] }
 0x36d   :  { %3449 = vmatprep.subr.mxu0 %v3171_v0  ;;  %3497 = vmatprep.mubr.msk.f32.mxu1 %vm3656_vm13, %v3654_v6 }
 0x36e   :  { %3450 = vmatpush3.msra.mxu0 %v3171_v0  ;;  %v2325_v0 = vld [vmem:[%s5011_s9] sm:$0xff] }
 0x36f   :  { %3451 = vmatprep.subr.mxu0 %v3170_v3 }
 0x370   :  { %3452 = vmatpush3.msra.mxu0 %v3170_v3  ;;  %v2536_v3 = vld [vmem:[%s5012_s10 + $0x38] sm:$0xf] }
 0x371   :  { %3453 = vmatprep.subr.mxu0 %v3169_v12 }
 0x372   :  { %3454 = vmatpush3.msra.mxu0 %v3169_v12  ;;  %v2535_v12 = vld [vmem:[%s5012_s10 + $0x30] sm:$0xff] }
 0x373   :  { %3455 = vmatprep.subr.mxu0 %v3168_v13 }
 0x374   :  { %3456 = vmatpush3.msra.mxu0 %v3168_v13  ;;  %v2534_v13 = vld [vmem:[%s5012_s10 + $0x28] sm:$0xff] }
 0x375   :  { %3457 = vmatprep.subr.mxu0 %v3167_v5 }
 0x376   :  { %3458 = vmatpush3.msra.mxu0 %v3167_v5  ;;  %v2533_v5 = vld [vmem:[%s5012_s10 + $0x20] sm:$0xff] }
 0x377   :  { %3459 = vmatprep.subr.mxu0 %v3166_v25 }
 0x378   :  { %3460 = vmatpush3.msra.mxu0 %v3166_v25  ;;  %v2532_v25 = vld [vmem:[%s5012_s10 + $0x18] sm:$0xff] }
 0x379   :  { %3461 = vmatprep.subr.mxu0 %v3165_v33 }
 0x37a   :  { %3462 = vmatpush3.msra.mxu0 %v3165_v33  ;;  %v2531_v33 = vld [vmem:[%s5012_s10 + $0x10] sm:$0xff] }
 0x37b   :  { %3463 = vmatprep.subr.mxu0 %v3164_v7 }
 0x37c   :  { %3464 = vmatpush3.msra.mxu0 %v3164_v7  ;;  %v2530_v7 = vld [vmem:[%s5012_s10 + $0x8] sm:$0xff] }
 0x37d   :  { %3466 = vmatmul.mubr.msk.f32.vlgmr.msra.gmra.mxu0 %vm1823_vm10, %v2133_v58  ;;  %3500 = vmatprep.subr.mxu0 %v3654_v6 }
 0x37e   :  { %3530 = vmatprep.mubr.msk.f32.mxu0 %vm3656_vm13, %v3654_v6  ;;  %3501 = vmatpush3.msk.msra.mxu0 %vm1597_vm6, %v2339_v35  ;;  %v3232_v35 = vld [vmem:[%s5012_s10 + $0x118] sm:$0xff] }
 0x37f   :  { %3502 = vmatprep.subr.mxu0 %v3654_v6 }
 0x380   :  { %3503 = vmatpush3.msra.mxu0 %v2338_v37  ;;  %v3200_v37 = vld [vmem:[%s5012_s10 + $0x48] sm:$0xff] }
 0x381   :  { %3504 = vmatprep.subr.mxu0 %v3654_v6 }
 0x382   :  { %3505 = vmatpush3.msra.mxu0 %v2337_v40  ;;  %v3230_v40 = vld [vmem:[%s5012_s10 + $0x108] sm:$0xff] }
 0x383   :  { %3506 = vmatprep.subr.mxu0 %v3654_v6 }
 0x384   :  { %3507 = vmatpush3.msra.mxu0 %v2336_v43 }
 0x385   :  { %3508 = vmatprep.subr.mxu0 %v3654_v6 }
 0x386   :  { %3509 = vmatpush3.msra.mxu0 %v2335_v45 }
 0x387   :  { %3510 = vmatprep.subr.mxu0 %v3654_v6 }
 0x388   :  { %3511 = vmatpush3.msra.mxu0 %v2334_v15  ;;  %v3225_v15 = vld [vmem:[%s5012_s10 + $0xf0] sm:$0xff] }
 0x389   :  { %3512 = vmatprep.subr.mxu0 %v3654_v6 }
 0x38a   :  { %3513 = vmatpush3.msra.mxu0 %v2333_v32  ;;  %v3224_v32 = vld [vmem:[%s5012_s10 + $0xe8] sm:$0xff] }
 0x38b   :  { %3514 = vmatprep.subr.mxu0 %v3654_v6 }
 0x38c   :  { %3515 = vmatpush3.msra.mxu0 %v2332_v46  ;;  %v3223_v46 = vld [vmem:[%s5012_s10 + $0xe0] sm:$0xff] }
 0x38d   :  { %3516 = vmatprep.subr.mxu0 %v3654_v6 }
 0x38e   :  { %3517 = vmatpush3.msra.mxu0 %v2331_v48  ;;  %v3222_v48 = vld [vmem:[%s5012_s10 + $0xd8] sm:$0xff] }
 0x38f   :  { %3518 = vmatprep.subr.mxu0 %v3654_v6 }
 0x390   :  { %3519 = vmatpush3.msra.mxu0 %v2330_v42  ;;  %v3221_v42 = vld [vmem:[%s5012_s10 + $0xd0] sm:$0xff] }
 0x391   :  { %3520 = vmatprep.subr.mxu0 %v3654_v6 }
 0x392   :  { %3521 = vmatpush3.msra.mxu0 %v2329_v50  ;;  %v3220_v50 = vld [vmem:[%s5012_s10 + $0xc8] sm:$0xff] }
 0x393   :  { %3522 = vmatprep.subr.mxu0 %v3654_v6 }
 0x394   :  { %3523 = vmatpush3.msra.mxu0 %v2328_v63  ;;  %v3219_v63 = vld [vmem:[%s5012_s10 + $0xc0] sm:$0xff] }
 0x395   :  { %3524 = vmatprep.subr.mxu0 %v3654_v6 }
 0x396   :  { %3525 = vmatpush3.msra.mxu0 %v2327_v51 }
 0x397   :  { %3526 = vmatprep.subr.mxu0 %v3654_v6 }
 0x398   :  { %3527 = vmatpush3.msra.mxu0 %v2326_v52 }
 0x399   :  { %3528 = vmatprep.subr.mxu0 %v3654_v6 }
 0x39a   :  { %3529 = vmatpush3.msra.mxu0 %v2325_v0 }
 0x39b   :  { %3571 = vmatprep.subr.mxu0 %v3654_v6 }
 0x40f   :  { %v3392_v9 = vpop.f32.mrf.mxu0 }
 0x410   :  { %1911 = vst.msk [vmem:[#allocation3 + $0x8] sm:$0x3] %vm1910_vm11, %v3392_v9  ;;  %v3216_v9 = vld [vmem:[%s5012_s10 + $0xb8] sm:$0xf] }
 0x411   :  { %v1899_v10 = vpop.f32.mrf.mxu0 }
 0x412   :  { %1909 = vst.msk [vmem:[#allocation3] sm:$0xff] %vm1908_vm12, %v1899_v10 }
 0x414   :  { %v3442_v36 = vpop.f32.mrf.mxu1 }
 0x416   :  { %v2105_v21 = vpop.f32.mrf.mxu1 }
 0x417   :  { %v1913_v17 = vld [vmem:[#allocation3 + $0x8] sm:$0x3] }
 0x419   :  { %v1912_v47 = vld [vmem:[#allocation3] sm:$0xff] }
 0x426   :  { %v3417_v31 = vpop.f32.mrf.mxu0 }
 0x427   :  { %v2012_v41 = vadd.f32 %v3417_v31, %v1913_v17  ;;  %v3215_v17 = vld [vmem:[%s5012_s10 + $0xb0] sm:$0xff] }
 0x428   :  { %v2002_v29 = vpop.f32.mrf.mxu0 }
 0x429   :  { %2014 = vst.msk [vmem:[#allocation3 + $0x8] sm:$0x3] %vm1910_vm11, %v2012_v41  ;;  %v2011_v11 = vadd.f32 %v2002_v29, %v1912_v47  ;;  %v3214_v41 = vld [vmem:[%s5012_s10 + $0xa8] sm:$0xff]  ;;  %v3213_v47 = vld [vmem:[%s5012_s10 + $0xa0] sm:$0xff]  ;;  %v3212_v29 = vld [vmem:[%s5012_s10 + $0x98] sm:$0xff] }
 0x42b   :  { %2013 = vst.msk [vmem:[#allocation3] sm:$0xff] %vm1908_vm12, %v2011_v11  ;;  %v3492_v49 = vpop.f32.mrf.mxu1  ;;  %v3211_v11 = vld [vmem:[%s5012_s10 + $0x90] sm:$0xff] }
 0x42d   :  { %v2311_v28 = vpop.f32.mrf.mxu1 }
 0x430   :  { %v2016_v16 = vld [vmem:[#allocation3 + $0x8] sm:$0x3] }
 0x431   :  { %v2115_v19 = vadd.f32 %v3442_v36, %v2016_v16  ;;  %v2529_v36 = vld [vmem:[%s5012_s10] sm:$0xff]  ;;  %v3210_v16 = vld [vmem:[%s5012_s10 + $0x88] sm:$0xff] }
 0x432   :  { %v2015_v18 = vld [vmem:[#allocation3] sm:$0xff] }
 0x433   :  { %2117 = vst.msk [vmem:[#allocation3 + $0x8] sm:$0x3] %vm1910_vm11, %v2115_v19  ;;  %v2114_v23 = vadd.f32 %v2105_v21, %v2015_v18  ;;  %v3209_v19 = vld [vmem:[%s5012_s10 + $0x80] sm:$0xff] }
 0x434   :  { %v3194_v21 = vld [vmem:[%s5004_s2] ss:$0 sm:$0xff] }
 0x435   :  { %2116 = vst.msk [vmem:[#allocation3] sm:$0xff] %vm1908_vm12, %v2114_v23 }
 0x43a   :  { %v2119_v1 = vld [vmem:[#allocation3 + $0x8] sm:$0x3] }
 0x43c   :  { %v2118_v22 = vld [vmem:[#allocation3] sm:$0xff] }
 0x43d   :  { %v3467_v14 = vpop.f32.mrf.mxu0 }
 0x43e   :  { %v2218_v4 = vadd.f32 %v3467_v14, %v2119_v1  ;;  %v3206_v1 = vld [vmem:[%s5012_s10 + $0x78] sm:$0xf] }
 0x43f   :  { %v2208_v24 = vpop.f32.mrf.mxu0 }
 0x440   :  { %2220 = vst.msk [vmem:[#allocation3 + $0x8] sm:$0x3] %vm1910_vm11, %v2218_v4  ;;  %v2217_v26 = vadd.f32 %v2208_v24, %v2118_v22  ;;  %v3205_v4 = vld [vmem:[%s5012_s10 + $0x70] sm:$0xff]  ;;  %v3236_v24 = vld [vmem:[%s5012_s10 + $0x138] sm:$0xf] }
 0x442   :  { %2219 = vst.msk [vmem:[#allocation3] sm:$0xff] %vm1908_vm12, %v2217_v26  ;;  %v3204_v26 = vld [vmem:[%s5012_s10 + $0x68] sm:$0xff] }
 0x447   :  { %v2222_v27 = vld [vmem:[#allocation3 + $0x8] sm:$0x3] }
 0x448   :  { %v2321_v53 = vadd.f32 %v3492_v49, %v2222_v27  ;;  %v3235_v49 = vld [vmem:[%s5012_s10 + $0x130] sm:$0xff]  ;;  %v3203_v27 = vld [vmem:[%s5012_s10 + $0x60] sm:$0xff] }
 0x449   :  { %v2221_v30 = vld [vmem:[#allocation3] sm:$0xff] }
 0x44a   :  { %2323 = vst.msk [vmem:[#allocation3 + $0x8] sm:$0x3] %vm1910_vm11, %v2321_v53  ;;  %v2320_v34 = vadd.f32 %v2311_v28, %v2221_v30  ;;  %v3234_v53 = vld [vmem:[%s5012_s10 + $0x128] sm:$0xff]  ;;  %v3202_v28 = vld [vmem:[%s5012_s10 + $0x58] sm:$0xff]  ;;  %v3233_v30 = vld [vmem:[%s5012_s10 + $0x120] sm:$0xff] }
 0x44c   :  { %2322 = vst.msk [vmem:[#allocation3] sm:$0xff] %vm1908_vm12, %v2320_v34  ;;  %v3201_v34 = vld [vmem:[%s5012_s10 + $0x50] sm:$0xff] }
 0x451   :  { %v2353_v20 = vld [vmem:[#allocation3 + $0x9] sm:$0x1]  ;;  %v2341_v38 = vld [vmem:[#allocation3 + $0x8] sm:$0x1] }
 0x452   :  { %2358 = vrot.lane.b32.xlu1 %v2353_v20, %s3655_s0  ;;  %2346 = vrot.lane.b32.xlu0 %v2341_v38, %s3655_s0 }
 0x453   :  { %v2352_v8 = vld [vmem:[#allocation3 + $0x1] sm:$0xff] }
 0x454   :  { %v2340_v44 = vld [vmem:[#allocation3] sm:$0xff] }
 0x456   :  { %2356 = vrot.lane.b32.xlu1 %v2352_v8, %s3655_s0  ;;  %2344 = vrot.lane.b32.xlu0 %v2340_v44, %s3655_s0 }
 0x4c4   :  { %v2359_v54 = vpop.permute.xlu1 %2358  ;;  %v2347_v57 = vpop.permute.xlu0 %2346 }
 0x4c5   :  { %v2363_v55 = vmax.f32 %v2353_v20, %v2359_v54  ;;  %v2351_v56 = vmax.f32 %v2341_v38, %v2347_v57  ;;  %v3231_v20 = vld [vmem:[%s5012_s10 + $0x110] sm:$0xff]  ;;  %v3199_v38 = vld [vmem:[%s5012_s10 + $0x40] sm:$0xff] }
 0x4c7   :  { %v2365_v58 = vmax.f32 %v2351_v56, %v2363_v55 }
 0x4c8   :  { %v2357_v59 = vpop.permute.xlu1 %2356  ;;  %v2345_v60 = vpop.permute.xlu0 %2344 }
 0x4c9   :  { %v2362_v61 = vmax.f32 %v2352_v8, %v2357_v59  ;;  %v2350_v39 = vmax.f32 %v2340_v44, %v2345_v60  ;;  %3494 = vmatpush3.msk.msra.mxu1 %vm2370_vm14, %v2365_v58  ;;  %v3226_v8 = vld [vmem:[%s5012_s10 + $0xf8] sm:$0xf]  ;;  %v3229_v44 = vld [vmem:[%s5012_s10 + $0x100] sm:$0xff]  ;;  %s3657_s10 = smov [#allocation4]  }
 0x4ca   :  { %3495 = vmatprep.subr.mxu1 %v3654_v6  ;;  %s2967_s16 = sshll.u32 %s3657_s10, 4  ;;  %s2968_s16 = int_to_ptr.vmem [resolvable:$true] %s2967_s16 }
 0x4cb   :  { %v2364_v62 = vmax.f32 %v2350_v39, %v2362_v61  ;;  %v2528_v61 = vld [vmem:[%s5005_s3] sm:$0x1]  ;;  %s3632_s8 = scalar_lea.vmem %s2968_s16, 16  ;;  %s3636_s17 = scalar_lea.vmem %s2968_s16, 32 }
 0x4cc   :  { %p3633_p0 = scmp.ne.s32.totalorder %s2968_s16, %s3632_s8  ;;  %p3637_p1 = scmp.lt.s32.totalorder %s2968_s16, %s2968_s16 }
 0x4cd   :  { %3496 = vmatpush3.msra.mxu1 %v2364_v62  ;;  %p3638_p2 = scmp.lt.s32.totalorder %s3636_s17, %s3632_s8 }
 0x4ce   :  { %3498 = vmatmul.mubr.msk.f32.vlgmr.msra.gmra.mxu1 %vm2366_vm15, %v2324_v2  ;;  %3533 = vmatprep.subr.mxu1 %v3654_v6 }
 0x4cf   :  { %3549 = vmatprep.mubr.msk.f32.mxu1 %vm3656_vm13, %v3654_v6  ;;  %3534 = vmatpush3.msk.msra.mxu1 %vm1635_vm7, %v2536_v3  ;;  %p3639_p3 = por %p3638_p2, %p3637_p1 }
 0x4d0   :  { %3535 = vmatprep.subr.mxu1 %v3654_v6 }
 0x4d1   :  { %3536 = vmatpush3.msra.mxu1 %v2535_v12  ;;  %p3640_p4 = pnand %p3639_p3, %p3633_p0 }
 0x4d2   :  { %3537 = vmatprep.subr.mxu1 %v3654_v6 }
 0x4d3   :  { %3538 = vmatpush3.msra.mxu1 %v2534_v13 }
 0x4d4   :  { %3539 = vmatprep.subr.mxu1 %v3654_v6 }
 0x4d5   :  { %3540 = vmatpush3.msra.mxu1 %v2533_v5 }
 0x4d6   :  { %3541 = vmatprep.subr.mxu1 %v3654_v6 }
 0x4d7   :  { %3542 = vmatpush3.msra.mxu1 %v2532_v25 }
 0x4d8   :  { %3543 = vmatprep.subr.mxu1 %v3654_v6 }
 0x4d9   :  { %3544 = vmatpush3.msra.mxu1 %v2531_v33 }
 0x4da   :  { %3545 = vmatprep.subr.mxu1 %v3654_v6 }
 0x4db   :  { %3546 = vmatpush3.msra.mxu1 %v2530_v7 }
 0x4dc   :  { %3547 = vmatprep.subr.mxu1 %v3654_v6 }
 0x4dd   :  { %3548 = vmatpush3.msra.mxu1 %v2529_v36 }
 0x4de   :  { %3552 = vmatprep.subr.mxu1 %v3654_v6 }
 0x58e   :  { %v2440_v10 = vpop.f32.mrf.mxu1 }
 0x58f   :  { %3531 = vmatmul.mubr.msk.f32.vlgmr.msra.gmra.mxu0 %vm2451_vm0, %v2440_v10 }
 0x590   :  { %v3499_v31 = vpop.f32.mrf.mxu1  ;;  %3572 = vmatpush3.msk.msra.mxu0 %vm1635_vm7, %v3216_v9  ;;  %3587 = vmatprep.mubr.msk.f32.mxu0 %vm3656_vm13, %v3654_v6 }
 0x591   :  { %3573 = vmatprep.subr.mxu0 %v3654_v6 }
 0x592   :  { %3574 = vmatpush3.msra.mxu0 %v3215_v17 }
 0x593   :  { %3575 = vmatprep.subr.mxu0 %v3654_v6 }
 0x594   :  { %3576 = vmatpush3.msra.mxu0 %v3214_v41 }
 0x595   :  { %3577 = vmatprep.subr.mxu0 %v3654_v6 }
 0x596   :  { %3578 = vmatpush3.msra.mxu0 %v3213_v47 }
 0x597   :  { %3579 = vmatprep.subr.mxu0 %v3654_v6 }
 0x598   :  { %3580 = vmatpush3.msra.mxu0 %v3212_v29 }
 0x599   :  { %3581 = vmatprep.subr.mxu0 %v3654_v6 }
 0x59a   :  { %3582 = vmatpush3.msra.mxu0 %v3211_v11 }
 0x59b   :  { %3583 = vmatprep.subr.mxu0 %v3654_v6 }
 0x59c   :  { %3584 = vmatpush3.msra.mxu0 %v3210_v16 }
 0x59d   :  { %3585 = vmatprep.subr.mxu0 %v3654_v6 }
 0x59e   :  { %3586 = vmatpush3.msra.mxu0 %v3209_v19 }
 0x59f   :  { %3609 = vmatprep.subr.mxu0 %v3654_v6 }
 0x64f   :  { %v2524_v18 = vpop.f32.mrf.mxu0 }
 0x650   :  { %v4881_v23 = vadd.f32 %v3194_v21, %v2524_v18 }
 0x651   :  { %v3532_v14 = vpop.f32.mrf.mxu0 }
 0x652   :  { %3550 = vmatmul.mubr.msk.f32.vlgmr.msra.gmra.mxu1 %vm2537_vm1, %v4881_v23  ;;  %v2710_v22 = vrot.slane %v4881_v23, 2  ;;  %v2624_v43 = vrot.slane %v4881_v23, 1  ;;  %v2882_v45 = vrot.slane %v4881_v23, 4  ;;  %v2796_v51 = vrot.slane %v4881_v23, 3 }
 0x653   :  { %3553 = vmatpush3.msk.msra.mxu1 %vm1635_vm7, %v3206_v1  ;;  %3568 = vmatprep.mubr.msk.f32.mxu1 %vm3656_vm13, %v3654_v6 }
 0x654   :  { %3554 = vmatprep.subr.mxu1 %v3654_v6  ;;  %3588 = vmatmul.mubr.msk.f32.vlgmr.msra.gmra.mxu0 %vm2537_vm1, %v2710_v22 }
 0x655   :  { %3555 = vmatpush3.msra.mxu1 %v3205_v4  ;;  %3610 = vmatpush3.msk.msra.mxu0 %vm1635_vm7, %v3236_v24 }
 0x656   :  { %3556 = vmatprep.subr.mxu1 %v3654_v6  ;;  %3611 = vmatprep.subr.mxu0 %v3654_v6 }
 0x657   :  { %3557 = vmatpush3.msra.mxu1 %v3204_v26  ;;  %3612 = vmatpush3.msra.mxu0 %v3235_v49 }
 0x658   :  { %3558 = vmatprep.subr.mxu1 %v3654_v6  ;;  %3613 = vmatprep.subr.mxu0 %v3654_v6 }
 0x659   :  { %3559 = vmatpush3.msra.mxu1 %v3203_v27  ;;  %3614 = vmatpush3.msra.mxu0 %v3234_v53 }
 0x65a   :  { %3560 = vmatprep.subr.mxu1 %v3654_v6  ;;  %3615 = vmatprep.subr.mxu0 %v3654_v6 }
 0x65b   :  { %3561 = vmatpush3.msra.mxu1 %v3202_v28  ;;  %3616 = vmatpush3.msra.mxu0 %v3233_v30 }
 0x65c   :  { %3562 = vmatprep.subr.mxu1 %v3654_v6  ;;  %3617 = vmatprep.subr.mxu0 %v3654_v6 }
 0x65d   :  { %3563 = vmatpush3.msra.mxu1 %v3201_v34  ;;  %3618 = vmatpush3.msra.mxu0 %v3232_v35 }
 0x65e   :  { %3564 = vmatprep.subr.mxu1 %v3654_v6  ;;  %3619 = vmatprep.subr.mxu0 %v3654_v6 }
 0x65f   :  { %3565 = vmatpush3.msra.mxu1 %v3200_v37  ;;  %3620 = vmatpush3.msra.mxu0 %v3231_v20 }
 0x660   :  { %3566 = vmatprep.subr.mxu1 %v3654_v6  ;;  %3621 = vmatprep.subr.mxu0 %v3654_v6 }
 0x661   :  { %3567 = vmatpush3.msra.mxu1 %v3199_v38  ;;  %3622 = vmatpush3.msra.mxu0 %v3230_v40 }
 0x662   :  { %3569 = vmatmul.mubr.msk.f32.vlgmr.msra.gmra.mxu1 %vm2537_vm1, %v2624_v43  ;;  %3590 = vmatprep.subr.mxu1 %v3654_v6 }
 0x663   :  { %3623 = vmatprep.subr.mxu0 %v3654_v6  ;;  %3591 = vmatpush3.msk.msra.mxu1 %vm1635_vm7, %v3226_v8 }
 0x664   :  { %3624 = vmatpush3.msra.mxu0 %v3229_v44  ;;  %3625 = vmatprep.mubr.msk.f32.mxu0 %vm3656_vm13, %v3654_v6 }
 0x665   :  { %3592 = vmatprep.subr.mxu1 %v3654_v6  ;;  %3626 = vmatmul.mubr.msk.f32.vlgmr.msra.gmra.mxu0 %vm2537_vm1, %v2882_v45 }
 0x666   :  { %3593 = vmatpush3.msra.mxu1 %v3225_v15  ;;  %3606 = vmatprep.mubr.msk.f32.mxu1 %vm3656_vm13, %v3654_v6 }
 0x667   :  { %3594 = vmatprep.subr.mxu1 %v3654_v6 }
 0x668   :  { %3595 = vmatpush3.msra.mxu1 %v3224_v32 }
 0x669   :  { %3596 = vmatprep.subr.mxu1 %v3654_v6 }
 0x66a   :  { %3597 = vmatpush3.msra.mxu1 %v3223_v46 }
 0x66b   :  { %3598 = vmatprep.subr.mxu1 %v3654_v6 }
 0x66c   :  { %3599 = vmatpush3.msra.mxu1 %v3222_v48 }
 0x66d   :  { %3600 = vmatprep.subr.mxu1 %v3654_v6 }
 0x66e   :  { %3601 = vmatpush3.msra.mxu1 %v3221_v42 }
 0x66f   :  { %3602 = vmatprep.subr.mxu1 %v3654_v6 }
 0x670   :  { %3603 = vmatpush3.msra.mxu1 %v3220_v50 }
 0x671   :  { %3604 = vmatprep.subr.mxu1 %v3654_v6 }
 0x672   :  { %3605 = vmatpush3.msra.mxu1 %v3219_v63 }
 0x673   :  { %3607 = vmatmul.mubr.msk.f32.vlgmr.msra.gmra.mxu1 %vm2537_vm1, %v2796_v51 }
 0x712   :  { %v2610_v52 = vpop.f32.mrf.mxu1 }
 0x713   :  { %v2614_v39 = vadd.f32 %v2610_v52, %v2528_v61 }
 0x714   :  { %v3551_v54 = vpop.f32.mrf.mxu1  ;;  %v2782_v57 = vpop.f32.mrf.mxu0 }
 0x716   :  { %v3589_v55 = vpop.f32.mrf.mxu0 }
 0x722   :  { %v2696_v56 = vpop.f32.mrf.mxu1 }
 0x723   :  { %v2700_v62 = vadd.f32 %v2696_v56, %v2614_v39 }
 0x724   :  { %v3570_v58 = vpop.f32.mrf.mxu1 }
 0x725   :  { %v2954_v59 = vpop.f32.mrf.mxu0  ;;  %v2786_v6 = vadd.f32 %v2782_v57, %v2700_v62 }
 0x727   :  { %v3627_v60 = vpop.f32.mrf.mxu0 }
 0x733   :  { %v2868_v2 = vpop.f32.mrf.mxu1 }
 0x734   :  { %v2872_v0 = vadd.f32 %v2868_v2, %v2786_v6 }
 0x735   :  { %v3608_v3 = vpop.f32.mrf.mxu1 }
 0x736   :  { %v2958_v12 = vadd.f32 %v2954_v59, %v2872_v0 }
 0x738   :  { %v2959_v13 = vmax.f32 %v2958_v12, 0.0 }
 0x73a   :  { %2960 = vst [vmem:[#allocation4] sm:$0x1] %v2959_v13 }
 0x73b   :  { %3643 = shalt.err (!%p3640_p4)
}
 0x73c   :  { %2970 = dma.vmem_to_hbm [thread:$0]  %s2968_s16, 16, %s5013_s11, [#allocation5]  }
 0x73d   :  { %3652 = dma.done.wait [#allocation5], 16  }
 0x73e   :  { %3653 = vsyncadd [#allocation5], 4294967280 }
 0x73f   :  { %2974 = vsyncpa [#allocation5], 1 }

</bundles_post_ra>
